<compile_context>
chip_gen: v7x
topology: tpu7x:2x2x1
jax: 0.10.0
libtpu: 0.0.40
codegen_flags: <defaults>
</compile_context>

<pallas_src>
import functools
import math

import jax
import jax.numpy as jnp
from jax.experimental import pallas as pl
from jax.experimental.pallas import tpu as pltpu


# ----------------------------------------------------------------------------
# Exact (erf-based) GELU, Mosaic-friendly.
# ----------------------------------------------------------------------------
_SQRT_HALF = 0.7071067811865476


def _erf(x):
    # Abramowitz & Stegun 7.1.26 rational approximation, |error| < 1.5e-7.
    a1, a2, a3, a4, a5 = (0.254829592, -0.284496736, 1.421413741,
                          -1.453152027, 1.061405429)
    p = 0.3275911
    sign = jnp.where(x < 0.0, -1.0, 1.0)
    ax = jnp.abs(x)
    t = 1.0 / (1.0 + p * ax)
    poly = ((((a5 * t + a4) * t + a3) * t + a2) * t + a1) * t
    return sign * (1.0 - poly * jnp.exp(-ax * ax))


def _gelu_exact(x):
    # PyTorch nn.GELU() default (erf form, not the tanh approximation).
    return 0.5 * x * (1.0 + _erf(x * _SQRT_HALF))


# ----------------------------------------------------------------------------
# Fused MLP kernel: one row-tile per grid step.
# ----------------------------------------------------------------------------
def _mlp_kernel(x_ref, w1_ref, b1_ref, w2_ref, b2_ref, o_ref, *, compute_dtype):
    x = x_ref[...]                                          # (TR, Din) f32
    # fc1 (MXU, low-precision operands, f32 accumulation) + bias (f32, VPU)
    h = jnp.dot(x.astype(compute_dtype), w1_ref[...],
                preferred_element_type=jnp.float32) + b1_ref[...]
    # GELU in f32 (VPU + EUP exp)
    h = _gelu_exact(h)
    # TODO(synk): nn.Dropout with p>0 / training mode not implemented
    #             (identity at eval, and the module default is drop=0.0).
    # fc2
    y = jnp.dot(h.astype(compute_dtype), w2_ref[...],
                preferred_element_type=jnp.float32) + b2_ref[...]
    o_ref[...] = y.astype(o_ref.dtype)


# ----------------------------------------------------------------------------
# Wrapper
# ----------------------------------------------------------------------------
def _round_up(x, m):
    return ((x + m - 1) // m) * m


def mlp_forward(x, params, *, row_tile=256):
    """Mlp.forward: fc1 -> GELU -> fc2 (dropout = identity at eval).

    x      : (..., in_features) f32
    params : (w1 (Din,H), b1 (1,H), w2 (H,Dout), b2 (1,Dout))
             weights may be bf16 (MXU operands); biases stay f32.
    """
    w1, b1, w2, b2 = params
    din = x.shape[-1]
    dhid = w1.shape[1]
    dout = w2.shape[1]
    assert w1.shape[0] == din and w2.shape[0] == dhid

    lead = x.shape[:-1]
    rows = int(math.prod(lead)) if lead else 1
    x2 = x.reshape(rows, din)

    # Row tile: multiple of 8 (f32 sublane), evenly dividing the padded rows.
    tr = min(row_tile, _round_up(rows, 8))
    rows_pad = _round_up(rows, tr)
    if rows_pad != rows:
        x2 = jnp.pad(x2, ((0, rows_pad - rows), (0, 0)))
    grid = (rows_pad // tr,)

    # Explicit VMEM budget: resident weights + double-buffered x/out tiles
    # + hidden-activation intermediate, with 2x headroom (clamped so it is
    # safe on every generation incl. v7x's 64 MiB physical VMEM).
    w_bytes = jnp.dtype(w1.dtype).itemsize
    need = (2 * tr * (din + dout) * 4           # double-buffered x / out tiles
            + (din * dhid + dhid * dout) * w_bytes   # VMEM-resident weights
            + (dhid + dout) * 4                 # biases
            + 2 * tr * dhid * 4)                # hidden intermediate headroom
    vmem_limit = int(min(max(2 * need, 16 << 20), 48 << 20))

    kernel = functools.partial(_mlp_kernel, compute_dtype=w1.dtype)
    out = pl.pallas_call(
        kernel,
        out_shape=jax.ShapeDtypeStruct((rows_pad, dout), x.dtype),
        grid=grid,
        in_specs=[
            pl.BlockSpec((tr, din), lambda i: (i, 0)),     # streamed row tile
            pl.BlockSpec((din, dhid), lambda i: (0, 0)),   # resident weights
            pl.BlockSpec((1, dhid), lambda i: (0, 0)),
            pl.BlockSpec((dhid, dout), lambda i: (0, 0)),
            pl.BlockSpec((1, dout), lambda i: (0, 0)),
        ],
        out_specs=pl.BlockSpec((tr, dout), lambda i: (i, 0)),
        compiler_params=pltpu.CompilerParams(
            dimension_semantics=("parallel",),
            vmem_limit_bytes=vmem_limit),
    )(x2, w1, b1, w2, b2)

    return out[:rows].reshape(*lead, dout)


# ----------------------------------------------------------------------------
# Parameter init (PyTorch nn.Linear default: U(+-1/sqrt(fan_in))).
# Weights are stored (in_features, out_features) so the kernel does x @ W.
# ----------------------------------------------------------------------------
def init_mlp_params(key, in_features, hidden_features=None, out_features=None,
                    compute_dtype=jnp.bfloat16):
    hidden_features = hidden_features or in_features
    out_features = out_features or in_features
    k1, k2, k3, k4 = jax.random.split(key, 4)
    lim1 = 1.0 / math.sqrt(in_features)
    lim2 = 1.0 / math.sqrt(hidden_features)
    w1 = jax.random.uniform(k1, (in_features, hidden_features), jnp.float32,
                            -lim1, lim1)
    b1 = jax.random.uniform(k2, (1, hidden_features), jnp.float32, -lim1, lim1)
    w2 = jax.random.uniform(k3, (hidden_features, out_features), jnp.float32,
                            -lim2, lim2)
    b2 = jax.random.uniform(k4, (1, out_features), jnp.float32, -lim2, lim2)
    return (w1.astype(compute_dtype), b1, w2.astype(compute_dtype), b2)


# ----------------------------------------------------------------------------
# Pure-JAX reference (same casts / same math) for correctness check.
# ----------------------------------------------------------------------------
def _ref_mlp(x, params):
    w1, b1, w2, b2 = params
    cd = w1.dtype
    lead = x.shape[:-1]
    x2 = x.reshape(-1, x.shape[-1])
    h = jnp.dot(x2.astype(cd), w1, preferred_element_type=jnp.float32) + b1
    h = _gelu_exact(h)
    y = jnp.dot(h.astype(cd), w2, preferred_element_type=jnp.float32) + b2
    return y.reshape(*lead, w2.shape[1]).astype(x.dtype)


# ----------------------------------------------------------------------------
if __name__ == "__main__":
    B, N = 2, 256                       # batch, tokens
    D_IN, D_HID, D_OUT = 128, 256, 128  # lane-dense feature dims

    root = jax.random.PRNGKey(0)
    k_x, k_p = jax.random.split(root)
    x = jax.random.normal(k_x, (B, N, D_IN), jnp.float32)
    params = init_mlp_params(k_p, D_IN, D_HID, D_OUT,
                             compute_dtype=jnp.bfloat16)

    out = jax.block_until_ready(mlp_forward(x, params, row_tile=128))
    assert out.shape == (B, N, D_OUT)

    ref = jax.block_until_ready(_ref_mlp(x, params))
    max_err = float(jnp.max(jnp.abs(out - ref)))
    assert max_err < 1e-2, f"mismatch vs reference: {max_err}"

    print("KERNEL_OK")
</pallas_src>

<mosaic_0001>
module attributes {stable_mosaic.version = 11 : i64} {
  func.func @_mlp_kernel(%arg0: i32, %arg1: memref<128x128xf32, #tpu.memory_space<vmem>>, %arg2: memref<128x256xbf16, #tpu.memory_space<vmem>>, %arg3: memref<1x256xf32, #tpu.memory_space<vmem>>, %arg4: memref<256x128xbf16, #tpu.memory_space<vmem>>, %arg5: memref<1x128xf32, #tpu.memory_space<vmem>>, %arg6: memref<128x128xf32, #tpu.memory_space<vmem>>) attributes {dimension_semantics = [#tpu.dimension_semantics<parallel>], iteration_bounds = array<i64: 4>, scalar_prefetch = 0 : i64, scratch_operands = 0 : i64, tpu.core_type = #tpu.core_type<tc>, window_params = [{transform_indices = @transform_0, window_bounds = array<i64: 128, 128>}, {pipeline_mode = #tpu.pipeline_mode<synchronous>, transform_indices = @transform_1, window_bounds = array<i64: 128, 256>}, {pipeline_mode = #tpu.pipeline_mode<synchronous>, transform_indices = @transform_2, window_bounds = array<i64: 1, 256>}, {pipeline_mode = #tpu.pipeline_mode<synchronous>, transform_indices = @transform_3, window_bounds = array<i64: 256, 128>}, {pipeline_mode = #tpu.pipeline_mode<synchronous>, transform_indices = @transform_4, window_bounds = array<i64: 1, 128>}, {transform_indices = @transform_5, window_bounds = array<i64: 128, 128>}]} {
    %c0 = arith.constant 0 : index
    %c0_0 = arith.constant 0 : index
    %0 = vector.load %arg1[%c0, %c0_0] : memref<128x128xf32, #tpu.memory_space<vmem>>, vector<128x128xf32>
    %1 = arith.truncf %0 : vector<128x128xf32> to vector<128x128xbf16>
    %c0_1 = arith.constant 0 : index
    %c0_2 = arith.constant 0 : index
    %2 = vector.load %arg2[%c0_1, %c0_2] : memref<128x256xbf16, #tpu.memory_space<vmem>>, vector<128x256xbf16>
    %cst = arith.constant dense<0.000000e+00> : vector<128x256xf32>
    %3 = tpu.matmul %1, %2, %cst {dimension_numbers = #tpu.dot_dimension_numbers<[1], [0], [0], [1], [0, 0, 1, 1], [], []>} : vector<128x128xbf16>, vector<128x256xbf16>, vector<128x256xf32> -> vector<128x256xf32>
    %c0_3 = arith.constant 0 : index
    %c0_4 = arith.constant 0 : index
    %4 = vector.load %arg3[%c0_3, %c0_4] : memref<1x256xf32, #tpu.memory_space<vmem>>, vector<1x256xf32>
    %5 = vector.broadcast %4 : vector<1x256xf32> to vector<128x256xf32>
    %6 = arith.addf %3, %5 : vector<128x256xf32>
    %cst_5 = arith.constant 5.000000e-01 : f32
    %7 = vector.broadcast %cst_5 : f32 to vector<128x256xf32>
    %8 = arith.mulf %7, %6 : vector<128x256xf32>
    %cst_6 = arith.constant 0.707106769 : f32
    %9 = vector.broadcast %cst_6 : f32 to vector<128x256xf32>
    %10 = arith.mulf %6, %9 : vector<128x256xf32>
    %cst_7 = arith.constant 0.000000e+00 : f32
    %11 = vector.broadcast %cst_7 : f32 to vector<128x256xf32>
    %12 = arith.cmpf olt, %10, %11 : vector<128x256xf32>
    %cst_8 = arith.constant -1.000000e+00 : f32
    %cst_9 = arith.constant 1.000000e+00 : f32
    %13 = vector.broadcast %cst_8 : f32 to vector<128x256xf32>
    %14 = vector.broadcast %cst_9 : f32 to vector<128x256xf32>
    %15 = arith.select %12, %13, %14 : vector<128x256xi1>, vector<128x256xf32>
    %16 = math.absf %10 : vector<128x256xf32>
    %cst_10 = arith.constant 0.327591091 : f32
    %17 = vector.broadcast %cst_10 : f32 to vector<128x256xf32>
    %18 = arith.mulf %17, %16 : vector<128x256xf32>
    %cst_11 = arith.constant 1.000000e+00 : f32
    %19 = vector.broadcast %cst_11 : f32 to vector<128x256xf32>
    %20 = arith.addf %19, %18 : vector<128x256xf32>
    %cst_12 = arith.constant 1.000000e+00 : f32
    %21 = vector.broadcast %cst_12 : f32 to vector<128x256xf32>
    %22 = arith.divf %21, %20 : vector<128x256xf32>
    %cst_13 = arith.constant 1.06140542 : f32
    %23 = vector.broadcast %cst_13 : f32 to vector<128x256xf32>
    %24 = arith.mulf %23, %22 : vector<128x256xf32>
    %cst_14 = arith.constant -1.45315206 : f32
    %25 = vector.broadcast %cst_14 : f32 to vector<128x256xf32>
    %26 = arith.addf %24, %25 : vector<128x256xf32>
    %27 = arith.mulf %26, %22 : vector<128x256xf32>
    %cst_15 = arith.constant 1.42141378 : f32
    %28 = vector.broadcast %cst_15 : f32 to vector<128x256xf32>
    %29 = arith.addf %27, %28 : vector<128x256xf32>
    %30 = arith.mulf %29, %22 : vector<128x256xf32>
    %cst_16 = arith.constant -0.284496725 : f32
    %31 = vector.broadcast %cst_16 : f32 to vector<128x256xf32>
    %32 = arith.addf %30, %31 : vector<128x256xf32>
    %33 = arith.mulf %32, %22 : vector<128x256xf32>
    %cst_17 = arith.constant 0.254829586 : f32
    %34 = vector.broadcast %cst_17 : f32 to vector<128x256xf32>
    %35 = arith.addf %33, %34 : vector<128x256xf32>
    %36 = arith.mulf %35, %22 : vector<128x256xf32>
    %cst_18 = arith.constant 0.000000e+00 : f32
    %37 = vector.broadcast %cst_18 : f32 to vector<128x256xf32>
    %38 = arith.subf %37, %16 : vector<128x256xf32>
    %39 = arith.mulf %38, %16 : vector<128x256xf32>
    %40 = math.exp %39 : vector<128x256xf32>
    %41 = arith.mulf %36, %40 : vector<128x256xf32>
    %cst_19 = arith.constant 1.000000e+00 : f32
    %42 = vector.broadcast %cst_19 : f32 to vector<128x256xf32>
    %43 = arith.subf %42, %41 : vector<128x256xf32>
    %44 = arith.mulf %15, %43 : vector<128x256xf32>
    %cst_20 = arith.constant 1.000000e+00 : f32
    %45 = vector.broadcast %cst_20 : f32 to vector<128x256xf32>
    %46 = arith.addf %45, %44 : vector<128x256xf32>
    %47 = arith.mulf %8, %46 : vector<128x256xf32>
    %48 = arith.truncf %47 : vector<128x256xf32> to vector<128x256xbf16>
    %c0_21 = arith.constant 0 : index
    %c0_22 = arith.constant 0 : index
    %49 = vector.load %arg4[%c0_21, %c0_22] : memref<256x128xbf16, #tpu.memory_space<vmem>>, vector<256x128xbf16>
    %cst_23 = arith.constant dense<0.000000e+00> : vector<128x128xf32>
    %50 = tpu.matmul %48, %49, %cst_23 {dimension_numbers = #tpu.dot_dimension_numbers<[1], [0], [0], [1], [0, 0, 1, 1], [], []>} : vector<128x256xbf16>, vector<256x128xbf16>, vector<128x128xf32> -> vector<128x128xf32>
    %c0_24 = arith.constant 0 : index
    %c0_25 = arith.constant 0 : index
    %51 = vector.load %arg5[%c0_24, %c0_25] : memref<1x128xf32, #tpu.memory_space<vmem>>, vector<1x128xf32>
    %52 = vector.broadcast %51 : vector<1x128xf32> to vector<128x128xf32>
    %53 = arith.addf %50, %52 : vector<128x128xf32>
    %c0_26 = arith.constant 0 : index
    %c0_27 = arith.constant 0 : index
    %54 = vector.load %arg6[%c0_26, %c0_27] : memref<128x128xf32, #tpu.memory_space<vmem>>, vector<128x128xf32>
    tpu.vector_store %arg6[%c0_26, %c0_27], %53 {strides = array<i32>} : memref<128x128xf32, #tpu.memory_space<vmem>>, vector<128x128xf32>,
    return
  }
  func.func @transform_0(%arg0: i32) -> (i32, i32) {
    %c0_i32 = arith.constant 0 : i32
    %c0_i32_0 = arith.constant 0 : i32
    return %arg0, %c0_i32 : i32, i32
  }
  func.func @transform_1(%arg0: i32) -> (i32, i32) {
    %c0_i32 = arith.constant 0 : i32
    %c0_i32_0 = arith.constant 0 : i32
    %c0_i32_1 = arith.constant 0 : i32
    return %c0_i32, %c0_i32_0 : i32, i32
  }
  func.func @transform_2(%arg0: i32) -> (i32, i32) {
    %c0_i32 = arith.constant 0 : i32
    %c0_i32_0 = arith.constant 0 : i32
    %c0_i32_1 = arith.constant 0 : i32
    return %c0_i32, %c0_i32_0 : i32, i32
  }
  func.func @transform_3(%arg0: i32) -> (i32, i32) {
    %c0_i32 = arith.constant 0 : i32
    %c0_i32_0 = arith.constant 0 : i32
    %c0_i32_1 = arith.constant 0 : i32
    return %c0_i32, %c0_i32_0 : i32, i32
  }
  func.func @transform_4(%arg0: i32) -> (i32, i32) {
    %c0_i32 = arith.constant 0 : i32
    %c0_i32_0 = arith.constant 0 : i32
    %c0_i32_1 = arith.constant 0 : i32
    return %c0_i32, %c0_i32_0 : i32, i32
  }
  func.func @transform_5(%arg0: i32) -> (i32, i32) {
    %c0_i32 = arith.constant 0 : i32
    %c0_i32_0 = arith.constant 0 : i32
    return %arg0, %c0_i32 : i32, i32
  }
}

</mosaic_0001>

<bundles_post_ra>
// kernel: tpu_custom_call.1
= control target key start
LH: loop header
LB: loop body
LE: loop exit
PB: predicated region body
PF: predicated region fallthrough
CT: control target
= control target key end

     0   :  { %10 = vsyncpa [#allocation3], 0  ;;  %s3561_s0 = inlined_call_operand.hbm [shape: f32[512,128], index: 0, kind: input, shape index: {}]   ;;  %s3562_s1 = inlined_call_operand.hbm [shape: bf16[128,256], index: 1, kind: input, shape index: {}]   ;;  %s3563_s2 = inlined_call_operand.vmem [shape: f32[1,256], index: 2, kind: input, shape index: {}]   ;;  %s3564_s3 = inlined_call_operand.hbm [shape: bf16[256,128], index: 3, kind: input, shape index: {}]   ;;  %s3565_s4 = inlined_call_operand.vmem [shape: f32[1,128], index: 4, kind: input, shape index: {}]   ;;  %s3566_s5 = inlined_call_operand.hbm [shape: f32[512,128], index: 5, kind: output, shape index: {}]  }
   0x1   :  { %12 = vsyncpa [#allocation3 + $0x1], 0 }
   0x2   :  { %13 = vsyncpa [#allocation6], 0 }
   0x3   :  { %14 = vsyncpa [#allocation4], 0 }
   0x4   :  { %16 = vsyncpa [#allocation4 + $0x1], 0  ;;  %s2314_s18 = smov 0   ;;  %s2316_s19 = smov 0  }
   0x5   :  { %s2318_s20 = smov 0   ;;  %s2320_s21 = smov 0  }
   0x6 LB: > { %s2335_s22 = sadd.s32 4294967295, %s2270_s21   ;;  %s1754_s23 = sadd.s32 4294967294, %s2270_s21   ;;  %s2270_s21 = sphi %s2320_s21, %s3652_s21   ;;  %s2266_s20 = sphi %s2318_s20, %s3651_s20   ;;  %s2262_s19 = sphi %s2316_s19, %s3650_s19   ;;  %s2258_s18 = sphi %s2314_s18, %s3649_s18  }
   0x7   : > { %p42_p0 = scmp.ne.s32.totalorder %s2262_s19, %s2258_s18  ;;  %p3567_p1 = scmp.eq.s32.totalorder %s2335_s22, 0 }
   0x8   : > { %p156_p3 = scmp.eq.s32.totalorder %s1754_s23, 3  ;;  %p1755_p5 = scmp.ge.s32.totalorder %s2270_s21, 1 }
   0x9   : > { %p2344_p4 = por %p3567_p1, %p42_p0  ;;  %p163_p7 = scmp.lt.s32.totalorder %s2270_s21, 5 }
   0xa   : > { %p2349_p6 = por %p156_p3, %p42_p0  ;;  %s2272_s27 = smov [#allocation5]  }
   0xb   : > { %s3583_s24 = scalar_select %p2344_p4, 1, 0 }
   0xc   : > { %s3584_s25 = scalar_select %p2349_p6, 1, 0 }
   0xd   : > { %p2354_p8 = pnand %p1755_p5, %p163_p7  ;;  %s175_s28 = sshll.u32 %s2272_s27, 4  ;;  %s176_s28 = int_to_ptr.vmem [resolvable:$true] %s175_s28 }
   0xe   : > { %s2273_s30 = smov [#allocation7]   ;;  %s2114_s9 = scalar_lea.hbm %s3562_s1, 2048 }
   0xf   : > { %s3585_s26 = scalar_select %p2354_p8, 1, 0 }
  0x10   : > { %p1883_p9 = pneg %p2354_p8  ;;  %s191_s6 = sshll.u32 %s2273_s30, 4  ;;  %s2366_s6 = int_to_ptr.vmem [resolvable:$true] %s191_s6 }
  0x11   : > { %p2115_p11 = scmp.ne.s32.totalorder %s3562_s1, %s2114_s9  ;;  %p2121_p3 = scmp.lt.u32.totalorder %s2114_s9, %s3562_s1 }
  0x12   : > { %p2362_p10 = pnand %p1883_p9, %p3567_p1 }
  0x14   : > { %p2116_p12 = pneg %p2362_p10 }
  0x16   : > { %p2117_p13 = pnand %p2116_p12, %p2115_p11 }
  0x18   : > { %p2118_p0 = pneg %p2117_p13 }
  0x1a   : > { %p2123_p5 = pnand %p2121_p3, %p2118_p0 }
  0x1c   : > { %2126 = shalt.err (!%p2123_p5)
}
  0x1d   : > { %s2127_s14 = scalar_lea.vmem %s176_s28, 2048  ;;  %p2135_p2 = scmp.lt.s32.totalorder %s176_s28, %s176_s28 }
  0x1e   : > { %p2128_p7 = scmp.ne.s32.totalorder %s176_s28, %s2127_s14  ;;  %p2136_p6 = scmp.lt.s32.totalorder %s2127_s14, %s2127_s14 }
  0x20   : > { %p2130_p9 = pnand %p2128_p7, %p2116_p12  ;;  %p2137_p4 = por %p2136_p6, %p2135_p2 }
  0x22   : > { %p2131_p1 = pneg %p2130_p9 }
  0x24   : > { %p2138_p8 = pnand %p2137_p4, %p2131_p1 }
  0x26   : > { %2141 = shalt.err (!%p2138_p8)
}
  0x27   : > { %s2274_s15 = smov 128   ;;  %s2275_s16 = smov 8  }
  0x28   : > { %1886 = dma.hbm_to_vmem [thread:$0]  (!%p2362_p10), %s3562_s1, 2048, %s176_s28, [#allocation6], %s2274_s15, %s2274_s15, %s2275_s16  }
  0x29   : > { %s2142_s7 = scalar_lea.hbm %s3564_s3, 2048 }
  0x2a   : > { %p2143_p1 = scmp.ne.s32.totalorder %s3564_s3, %s2142_s7  ;;  %p2149_p6 = scmp.lt.u32.totalorder %s2142_s7, %s3564_s3 }
  0x2c   : > { %p2145_p2 = pnand %p2143_p1, %p2116_p12 }
  0x2e   : > { %p2146_p4 = pneg %p2145_p2 }
  0x30   : > { %p2151_p8 = pnand %p2149_p6, %p2146_p4 }
  0x32   : > { %2154 = shalt.err (!%p2151_p8)
}
  0x33   : > { %s2155_s28 = scalar_lea.vmem %s2366_s6, 2048  ;;  %p2163_p3 = scmp.lt.s32.totalorder %s2366_s6, %s2366_s6 }
  0x34   : > { %p2156_p11 = scmp.ne.s32.totalorder %s2366_s6, %s2155_s28  ;;  %p2164_p5 = scmp.lt.s32.totalorder %s2155_s28, %s2155_s28 }
  0x36   : > { %p2158_p13 = pnand %p2156_p11, %p2116_p12  ;;  %p2165_p7 = por %p2164_p5, %p2163_p3 }
  0x38   : > { %p2159_p0 = pneg %p2158_p13 }
  0x3a   : > { %p2166_p9 = pnand %p2165_p7, %p2159_p0 }
  0x3c   : > { %2169 = shalt.err (!%p2166_p9)
}
  0x3d   : > { %s2276_s12 = smov 64   ;;  %s2277_s13 = smov 4  }
  0x3e   : > { %1889 = dma.hbm_to_vmem [thread:$0]  (!%p2362_p10), %s3564_s3, 2048, %s2366_s6, [#allocation6], %s2276_s12, %s2276_s12, %s2277_s13  }
  0x3f   : > { %s2419_s23 = sadd.s32 1, %s2270_s21   ;;  %s29_s30 = sadd.s32 1, %s2266_s20 }
  0x40   : > { %s26_s27 = ssub.s32 %s2270_s21, %s2419_s23  ;;  %p36_p1 = scmp.ne.s32.totalorder %s2266_s20, %s2262_s19 }
  0x41   : > { %p27_p12 = scmp.eq.s32.totalorder %s26_s27, 0  ;;  %p37_p2 = scmp.eq.s32.totalorder %s2270_s21, 0 }
  0x42   : > { %p3587_p6 = scmp.eq.s32.totalorder %s2335_s22, 3  ;;  %p1900_p11 = scmp.lt.s32.totalorder %s2270_s21, 4 }
  0x43   : > { %s2428_s7 = scalar_select %p27_p12, %s2266_s20, %s29_s30  }
  0x44   : > { %p38_p4 = por %p37_p2, %p36_p1  ;;  %p2432_p8 = por %p3587_p6, %p36_p1 }
  0x45   : > { %s208_s29 = sand.u32 1, %s2266_s20   ;;  %s1805_s6 = sshll.u32 %s2270_s21, 11 }
  0x46   : > { %s1759_s9 = sshll.u32 %s208_s29, 7  ;;  %s2442_s28 = scalar_lea.hbm %s3561_s0, %s1805_s6 }
  0x47   : > { %s212_s12 = scalar_lea.vmem [#allocation2], %s1759_s9  ;;  %p2446_p10 = pnand %p1900_p11, %p38_p4 }
  0x48   : > { %s219_s13 = sshll.u32 %s212_s12, 4  ;;  %s2450_s17 = scalar_lea.sflag [#allocation3], %s208_s29  ;;  %s2444_s13 = int_to_ptr.vmem [resolvable:$true] %s219_s13 }
  0x49   : > { %s2170_s27 = scalar_lea.hbm %s2442_s28, 2048  ;;  %p2172_p0 = pneg %p2446_p10 }
  0x4a   : > { %p2171_p13 = scmp.ne.s32.totalorder %s2442_s28, %s2170_s27  ;;  %s2175_s6 = scalar_lea.hbm %s3561_s0, 8192 }
  0x4b   : > { %p2176_p7 = scmp.lt.u32.totalorder %s2442_s28, %s3561_s0  ;;  %p2177_p9 = scmp.lt.u32.totalorder %s2175_s6, %s2170_s27 }
  0x4c   : > { %p2173_p3 = pnand %p2172_p0, %p2171_p13  ;;  %p2179_p1 = scmp.lt.u32.totalorder %s2170_s27, %s2442_s28 }
  0x4d   : > { %p2178_p12 = por %p2177_p9, %p2176_p7 }
  0x4e   : > { %p2174_p5 = pneg %p2173_p3 }
  0x4f   : > { %p2180_p2 = por %p2179_p1, %p2178_p12 }
  0x51   : > { %p2181_p4 = pnand %p2180_p2, %p2174_p5 }
  0x53   : > { %2184 = shalt.err (!%p2181_p4)
}
  0x54   : > { %s2185_s29 = scalar_lea.vmem %s2444_s13, 2048  ;;  %s2278_s12 = smov [#allocation2]  }
  0x55   : > { %p2186_p6 = scmp.ne.s32.totalorder %s2444_s13, %s2185_s29  ;;  %s2190_s30 = sshll.u32 %s2278_s12, 4  ;;  %s2191_s30 = int_to_ptr.vmem [resolvable:$false] %s2190_s30 }
  0x56   : > { %s2192_s9 = scalar_lea.vmem %s2191_s30, 4096  ;;  %p2193_p3 = scmp.lt.s32.totalorder %s2444_s13, %s2191_s30 }
  0x57   : > { %p2188_p11 = pnand %p2186_p6, %p2172_p0  ;;  %p2194_p7 = scmp.lt.s32.totalorder %s2192_s9, %s2185_s29 }
  0x59   : > { %p2189_p13 = pneg %p2188_p11  ;;  %p2195_p9 = por %p2194_p7, %p2193_p3 }
  0x5b   : > { %p2196_p12 = pnand %p2195_p9, %p2189_p13 }
  0x5d   : > { %2199 = shalt.err (!%p2196_p12)
}
  0x5e   : > { %1893 = dma.hbm_to_vmem [thread:$0]  (!%p2446_p10), %s2442_s28, 2048, %s2444_s13, %s2450_s17, %s2274_s15, %s2274_s15, %s2275_s16  }
  0x5f   : > { %p3590_p0 = scmp.ne.s32.totalorder %s3585_s26, 0 }
  0x61   : > { %231 = sbr.rel (%p3590_p0) target bundleno = 845 (0x34d), region = 40 }
  0x68   : > { %s2484_s27 = sand.u32 1, %s2262_s19   ;;  %p3591_p5 = scmp.ne.s32.totalorder %s3583_s24, 0 }
  0x69   : > { %s1763_s6 = sshll.u32 %s2484_s27, 7  ;;  %s234_s10 = scalar_lea.sflag [#allocation3], %s2484_s27 }
  0x6a   : > { %s2490_s14 = scalar_lea.vmem [#allocation2], %s1763_s6 }
  0x6b   : > { %2245 = dma.done.wait (%p3591_p5), %s234_s10, 2048  }
  0x6c   : > { %2247 = vsyncadd (%p3591_p5), %s234_s10, 4294965248  ;;  %p3592_p10 = scmp.eq.s32.totalorder %s2335_s22, 0 }
  0x6e   : > { %2249 = dma.done.wait (%p3592_p10), [#allocation6], 4096   ;;  %p3593_p1 = pmov %p3592_p10 }
  0x6f   : > { %v2279_v0 = vmov 0   ;;  %v1946_v1 = vld [vmem:[#allocation5 + $0x4] ss:$8 sps:$4 sm:$0xff]   ;;  %v1948_v2 = vld [vmem:[#allocation5] ss:$8 sps:$4 sm:$0xff]   ;;  %v277_v20 = vld [vmem:[%s2490_s14 + $0x10] sm:$0xff]  ;;  %v317_v50 = vlaneseq }
  0x70   : > { %2251 = vsyncadd (%p3593_p1), [#allocation6], 4294963200  ;;  %439 = vmatprep.mubr.bf16.mxu0 %v2279_v0  ;;  %407 = vmatprep.subr.bf16.mxu0 %v1946_v1  ;;  %v1949_v3 = vld [vmem:[#allocation5 + $0x14] ss:$8 sps:$4 sm:$0xff]   ;;  %v1951_v4 = vld [vmem:[#allocation5 + $0x10] ss:$8 sps:$4 sm:$0xff]  }
  0x71   : > { %408 = vmatpush1.bf16.msra.mxu0 %v1948_v2  ;;  %v1952_v5 = vld [vmem:[#allocation5 + $0x24] ss:$8 sps:$4 sm:$0xff]   ;;  %v1954_v6 = vld [vmem:[#allocation5 + $0x20] ss:$8 sps:$4 sm:$0xff]   ;;  %v1955_v7 = vld [vmem:[#allocation5 + $0x34] ss:$8 sps:$4 sm:$0xff]  }
  0x72   : > { %409 = vmatprep.subr.bf16.mxu0 %v1949_v3  ;;  %v1957_v8 = vld [vmem:[#allocation5 + $0x30] ss:$8 sps:$4 sm:$0xff]   ;;  %v1958_v9 = vld [vmem:[#allocation5 + $0x44] ss:$8 sps:$4 sm:$0xff]   ;;  %v1960_v10 = vld [vmem:[#allocation5 + $0x40] ss:$8 sps:$4 sm:$0xff]  }
  0x73   : > { %v1961_v11 = vld [vmem:[#allocation5 + $0x54] ss:$8 sps:$4 sm:$0xff]   ;;  %v1963_v12 = vld [vmem:[#allocation5 + $0x50] ss:$8 sps:$4 sm:$0xff]   ;;  %v1964_v13 = vld [vmem:[#allocation5 + $0x64] ss:$8 sps:$4 sm:$0xff]  }
  0x74   : > { %v1966_v14 = vld [vmem:[#allocation5 + $0x60] ss:$8 sps:$4 sm:$0xff]   ;;  %v1967_v15 = vld [vmem:[#allocation5 + $0x74] ss:$8 sps:$4 sm:$0xff]   ;;  %v1969_v16 = vld [vmem:[#allocation5 + $0x70] ss:$8 sps:$4 sm:$0xff]  }
  0x75   : > { %410 = vmatpush1.bf16.msra.mxu0 %v1951_v4  ;;  %v275_v17 = vld [vmem:[%s2490_s14] sm:$0xff]  ;;  %v276_v18 = vld [vmem:[%s2490_s14 + $0x8] sm:$0xff]  ;;  %v278_v21 = vld [vmem:[%s2490_s14 + $0x18] sm:$0xff]  ;;  %v318_v51 = vshrl.u32 %v317_v50, 7  ;;  %s3478_s28 = scalar_lea.vmem [#allocation8], %s1763_s6  ;;  %s1806_s13 = sshll.u32 %s2335_s22, 11 }
  0x76   : > { %411 = vmatprep.subr.bf16.mxu0 %v1952_v5  ;;  %v291_v19 = vpack.c.bf16 %v276_v18, %v275_v17  ;;  %v292_v22 = vpack.c.bf16 %v278_v21, %v277_v20  ;;  %v279_v23 = vld [vmem:[%s2490_s14 + $0x20] sm:$0xff]  ;;  %v280_v24 = vld [vmem:[%s2490_s14 + $0x28] sm:$0xff]  ;;  %v281_v26 = vld [vmem:[%s2490_s14 + $0x30] sm:$0xff]  ;;  %s1662_s17 = sshll.u32 %s3478_s28, 4  ;;  %s3513_s12 = scalar_lea.hbm %s3566_s5, %s1806_s13  ;;  %s3515_s17 = int_to_ptr.vmem [resolvable:$true] %s1662_s17 }
  0x77   : > { %v293_v25 = vpack.c.bf16 %v280_v24, %v279_v23  ;;  %v282_v27 = vld [vmem:[%s2490_s14 + $0x38] sm:$0xff]  ;;  %v283_v29 = vld [vmem:[%s2490_s14 + $0x40] sm:$0xff]  ;;  %v284_v30 = vld [vmem:[%s2490_s14 + $0x48] sm:$0xff]  ;;  %v319_v53 = vsub.s32 0, %v318_v51  ;;  %v323_v55 = vsub.s32 1, %v318_v51  ;;  %s1649_s22 = scalar_lea.sflag [#allocation4], %s2484_s27 }
  0x78   : > { %v294_v28 = vpack.c.bf16 %v282_v27, %v281_v26  ;;  %v295_v31 = vpack.c.bf16 %v284_v30, %v283_v29  ;;  %v285_v32 = vld [vmem:[%s2490_s14 + $0x50] sm:$0xff]  ;;  %v286_v33 = vld [vmem:[%s2490_s14 + $0x58] sm:$0xff]  ;;  %v287_v35 = vld [vmem:[%s2490_s14 + $0x60] sm:$0xff]  ;;  %s2200_s30 = scalar_lea.vmem %s3515_s17, 2048  ;;  %s2281_s9 = smov [#allocation8]  }
  0x79   : > { %412 = vmatpush1.bf16.msra.mxu0 %v1954_v6  ;;  %v296_v34 = vpack.c.bf16 %v286_v33, %v285_v32  ;;  %v288_v36 = vld [vmem:[%s2490_s14 + $0x68] sm:$0xff]  ;;  %v289_v38 = vld [vmem:[%s2490_s14 + $0x70] sm:$0xff]  ;;  %v290_v39 = vld [vmem:[%s2490_s14 + $0x78] sm:$0xff]  ;;  %p2201_p2 = scmp.ne.s32.totalorder %s3515_s17, %s2200_s30  ;;  %s2204_s6 = sshll.u32 %s2281_s9, 4  ;;  %s2205_s6 = int_to_ptr.vmem [resolvable:$false] %s2204_s6 }
  0x7a   : > { %413 = vmatprep.subr.bf16.mxu0 %v1955_v7  ;;  %v297_v37 = vpack.c.bf16 %v288_v36, %v287_v35  ;;  %v298_v40 = vpack.c.bf16 %v290_v39, %v289_v38  ;;  %v1970_v41 = vld [vmem:[#allocation7 + $0x40] sm:$0xff]   ;;  %v1972_v43 = vld [vmem:[#allocation7 + $0x48] sm:$0xff]   ;;  %v1974_v45 = vld [vmem:[#allocation7 + $0x50] sm:$0xff]   ;;  %s2206_s10 = scalar_lea.vmem %s2205_s6, 4096  ;;  %p2207_p11 = scmp.lt.s32.totalorder %s3515_s17, %s2205_s6 }
  0x7b   : > { %1807 = vmatprep.subr.bf16.mxu1 %v1970_v41  ;;  %v1971_v42 = vld [vmem:[#allocation7] sm:$0xff]   ;;  %v1973_v44 = vld [vmem:[#allocation7 + $0x8] sm:$0xff]   ;;  %v1975_v46 = vld [vmem:[#allocation7 + $0x10] sm:$0xff]   ;;  %p2202_p4 = pnand %p2201_p2, %p2432_p8  ;;  %p2208_p13 = scmp.lt.s32.totalorder %s2206_s10, %s2200_s30 }
  0x7c   : > { %1808 = vmatpush3.bf16.msra.mxu1 %v1971_v42  ;;  %v1976_v47 = vld [vmem:[#allocation7 + $0x58] sm:$0xff]   ;;  %v1978_v49 = vld [vmem:[#allocation7 + $0x60] sm:$0xff]   ;;  %v1980_v3 = vld [vmem:[#allocation7 + $0x68] sm:$0xff]  }
  0x7d   : > { %414 = vmatpush1.bf16.msra.mxu0 %v1957_v8  ;;  %1809 = vmatprep.subr.bf16.mxu1 %v1972_v43  ;;  %v1977_v48 = vld [vmem:[#allocation7 + $0x18] sm:$0xff]   ;;  %v1979_v52 = vld [vmem:[#allocation7 + $0x20] sm:$0xff]   ;;  %v1981_v6 = vld [vmem:[#allocation7 + $0x28] sm:$0xff]   ;;  %p2203_p6 = pneg %p2202_p4  ;;  %p2209_p3 = por %p2208_p13, %p2207_p11 }
  0x7e   : > { %415 = vmatprep.subr.bf16.mxu0 %v1958_v9  ;;  %v315_v54 = vld [vmem:[%s3563_s2] sm:$0x3] }
  0x7f   : > { %v2527_v56 = vrot.slane %v315_v54, %v319_v53  ;;  %v2529_v57 = vrot.slane %v315_v54, %v323_v55  ;;  %p2210_p7 = pnand %p2209_p3, %p2203_p6 }
  0x80   : > { %1810 = vmatpush3.bf16.msra.mxu1 %v1973_v44 }
  0x81   : > { %416 = vmatpush1.bf16.msra.mxu0 %v1960_v10  ;;  %1811 = vmatprep.subr.bf16.mxu1 %v1974_v45 }
  0x82   : > { %417 = vmatprep.subr.bf16.mxu0 %v1961_v11 }
  0x84   : > { %1812 = vmatpush3.bf16.msra.mxu1 %v1975_v46 }
  0x85   : > { %418 = vmatpush1.bf16.msra.mxu0 %v1963_v12  ;;  %1813 = vmatprep.subr.bf16.mxu1 %v1976_v47 }
  0x86   : > { %419 = vmatprep.subr.bf16.mxu0 %v1964_v13 }
  0x88   : > { %1814 = vmatpush3.bf16.msra.mxu1 %v1977_v48 }
  0x89   : > { %420 = vmatpush1.bf16.msra.mxu0 %v1966_v14  ;;  %1815 = vmatprep.subr.bf16.mxu1 %v1978_v49 }
  0x8a   : > { %421 = vmatprep.subr.bf16.mxu0 %v1967_v15 }
  0x8c   : > { %1816 = vmatpush3.bf16.msra.mxu1 %v1979_v52 }
  0x8d   : > { %422 = vmatpush1.bf16.msra.mxu0 %v1969_v16  ;;  %1817 = vmatprep.subr.bf16.mxu1 %v1980_v3  ;;  %v1982_v16 = vld [vmem:[#allocation7 + $0x70] sm:$0xff]  }
  0x90   : > { %440 = vmatmul.mubr.bf16.vlgmr.msra.gmra.mrb[0].mxu0 %v291_v19  ;;  %1818 = vmatpush3.bf16.msra.mxu1 %v1981_v6 }
  0x91   : > { %449 = vmatprep.mubr.bf16.mxu0 %v2279_v0  ;;  %1819 = vmatprep.subr.bf16.mxu1 %v1982_v16 }
  0x98   : > { %450 = vmatmul.mubr.bf16.gmra.mrb[4].mxu0 %v292_v22 }
  0x99   : > { %459 = vmatprep.mubr.bf16.mxu0 %v2279_v0 }
  0xa0   : > { %460 = vmatmul.mubr.bf16.gmra.mrb[8].mxu0 %v293_v25 }
  0xa1   : > { %469 = vmatprep.mubr.bf16.mxu0 %v2279_v0 }
  0xa8   : > { %470 = vmatmul.mubr.bf16.gmra.mrb[12].mxu0 %v294_v28 }
  0xa9   : > { %479 = vmatprep.mubr.bf16.mxu0 %v2279_v0 }
  0xb0   : > { %480 = vmatmul.mubr.bf16.gmra.mrb[16].mxu0 %v295_v31  ;;  %v1983_v31 = vld [vmem:[#allocation7 + $0x30] sm:$0xff]  }
  0xb1   : > { %489 = vmatprep.mubr.bf16.mxu0 %v2279_v0  ;;  %1820 = vmatpush3.bf16.msra.mxu1 %v1983_v31 }
  0xb8   : > { %490 = vmatmul.mubr.bf16.gmra.mrb[20].mxu0 %v296_v34 }
  0xb9   : > { %499 = vmatprep.mubr.bf16.mxu0 %v2279_v0 }
  0xc0   : > { %500 = vmatmul.mubr.bf16.gmra.mrb[24].mxu0 %v297_v37 }
  0xc1   : > { %509 = vmatprep.mubr.bf16.mxu0 %v2279_v0 }
  0xc8   : > { %510 = vmatmul.mubr.bf16.gmra.mrb[28].mxu0 %v298_v40  ;;  %v3570_v40 = vmov 1.0  }
 0x163   : > { %v441_v58 = vpop.f32.mrb[0].mxu0 }
 0x164   : > { %v442_v59 = vadd.f32 %v441_v58, %v2527_v56  ;;  %v443_v60 = vpop.f32.mrb[1].mxu0 }
 0x165   : > { %v444_v61 = vadd.f32 %v443_v60, %v2529_v57  ;;  %v445_v62 = vpop.f32.mrb[2].mxu0 }
 0x166   : > { %v552_v63 = vmul.f32 0.70710677, %v442_v59  ;;  %v446_v0 = vadd.f32 %v445_v62, %v2527_v56  ;;  %v447_v1 = vpop.f32.mrb[3].mxu0  ;;  %v2553_v36 = vmul.f32 0.5, %v442_v59 }
 0x167   : > { %v2534_v2 = vmul.f32 0.70710677, %v444_v61  ;;  %v448_v10 = vadd.f32 %v447_v1, %v2529_v57  ;;  %v2565_v42 = vmul.f32 0.5, %v444_v61 }
 0x168   : > { %v648_v4 = vand.u32 2147483647, %v552_v63  ;;  %v2536_v5 = vmul.f32 0.70710677, %v446_v0  ;;  %vm584_vm0 = vcmp.lt.f32.partialorder %v552_v63, 0.0  ;;  %v2567_v43 = vmul.f32 0.5, %v446_v0 }
 0x169   : > { %3594 = vst [vmem:[#allocation12_spill] sm:$0xff] %v2534_v2  ;;  %v649_v8 = vand.u32 2147483647, %v2534_v2  ;;  %v2541_v19 = vmul.f32 0.70710677, %v448_v10  ;;  %v2563_v41 = vsel %vm584_vm0, -1.0, %v3570_v40 }
 0x16a   : > { %v680_v7 = vmul.f32 0.3275911, %v648_v4  ;;  %v650_v9 = vand.u32 2147483647, %v2536_v5  ;;  %v1096_v11 = vsub.f32 0.0, %v648_v4  ;;  %3596 = vst [vmem:[#allocation14_spill] sm:$0xff] %v2565_v42 }
 0x16b   : > { %v451_v14 = vpop.f32.mrb[4].mxu0  ;;  %v1097_v17 = vsub.f32 0.0, %v649_v8  ;;  %3595 = vst [vmem:[#allocation13_spill] sm:$0xff] %v2541_v19  ;;  %v681_v22 = vmul.f32 0.3275911, %v649_v8  ;;  %vm586_vm1 = vcmp.lt.f32.partialorder %v2536_v5, 0.0 }
 0x16c   : > { %v712_v12 = vadd.f32 1.0, %v680_v7  ;;  %v682_v13 = vmul.f32 0.3275911, %v650_v9  ;;  %v453_v15 = vpop.f32.mrb[5].mxu0  ;;  %v1128_v21 = vmul.f32 %v1096_v11, %v648_v4  ;;  %v452_v24 = vadd.f32 %v451_v14, %v2527_v56 }
 0x16d   : > { %v455_v20 = vpop.f32.mrb[6].mxu0  ;;  %v454_v25 = vadd.f32 %v453_v15, %v2529_v57  ;;  %v1098_v26 = vsub.f32 0.0, %v650_v9  ;;  %v1129_v28 = vmul.f32 %v1097_v17, %v649_v8  ;;  %v651_v29 = vand.u32 2147483647, %v2541_v19 }
 0x16e   : > { %1986 = vrcp.f32 %v712_v12  ;;  %v714_v18 = vadd.f32 1.0, %v682_v13  ;;  %v457_v23 = vpop.f32.mrb[7].mxu0  ;;  %v2546_v27 = vadd.f32 %v455_v20, %v2527_v56  ;;  %v2549_v30 = vmul.f32 0.70710677, %v452_v24 }
 0x16f   : > { %v1160_v32 = vmul.f32 1.442695, %v1128_v21  ;;  %v713_v33 = vadd.f32 1.0, %v681_v22  ;;  %v2551_v34 = vmul.f32 0.70710677, %v454_v25  ;;  %v1130_v47 = vmul.f32 %v1098_v26, %v650_v9 }
 0x170   : > { %1988 = vrcp.f32 %v714_v18  ;;  %v652_v37 = vand.u32 2147483647, %v2549_v30  ;;  %v2557_v38 = vmul.f32 0.70710677, %v2546_v27  ;;  %v1162_v46 = vmul.f32 1.442695, %v1129_v28 }
 0x171   : > { %v2570_v44 = vand.u32 2147483647, %v2551_v34  ;;  %1990 = vrcp.f32 %v713_v33  ;;  %v1099_v50 = vsub.f32 0.0, %v651_v29  ;;  %v683_v54 = vmul.f32 0.3275911, %v651_v29 }
 0x172   : > { %v684_v48 = vmul.f32 0.3275911, %v652_v37  ;;  %v2579_v52 = vand.u32 2147483647, %v2557_v38  ;;  %1992 = vpow2.f32 %v1160_v32  ;;  %v2584_v58 = vadd.f32 %v457_v23, %v2529_v57 }
 0x173   : > { %v461_v35 = vpop.f32.mrb[8].mxu0  ;;  %v685_v51 = vmul.f32 0.3275911, %v2570_v44  ;;  %v2594_v63 = vsel %vm586_vm1, -1.0, %v3570_v40  ;;  %v1164_v0 = vmul.f32 1.442695, %v1130_v47  ;;  %v1131_v4 = vmul.f32 %v1099_v50, %v651_v29 }
 0x174   : > { %v2559_v39 = vpop.f32.mrb[9].mxu0  ;;  %v716_v55 = vadd.f32 1.0, %v684_v48  ;;  %v686_v61 = vmul.f32 0.3275911, %v2579_v52  ;;  %v2589_v62 = vadd.f32 %v461_v35, %v2527_v56  ;;  %v2596_v1 = vmul.f32 0.5, %v448_v10  ;;  %v1984_v48 = vld [vmem:[#allocation7 + $0x78] sm:$0xff]  }
 0x175   : > { %v2572_v45 = vpop.f32.mrb[10].mxu0  ;;  %v717_v60 = vadd.f32 1.0, %v685_v51  ;;  %v715_v9 = vadd.f32 1.0, %v683_v54  ;;  %v1100_v11 = vsub.f32 0.0, %v652_v37  ;;  %v2603_v12 = vmul.f32 0.70710677, %v2584_v58  ;;  %1821 = vmatprep.subr.bf16.mxu1 %v1984_v48 }
 0x176   : > { %v2575_v49 = vpop.f32.mrb[11].mxu0  ;;  %3597 = vst [vmem:[#allocation15_spill] sm:$0xff] %v2596_v1  ;;  %1994 = vrcp.f32 %v716_v55  ;;  %v718_v6 = vadd.f32 1.0, %v686_v61  ;;  %v2609_v14 = vmul.f32 0.5, %v452_v24  ;;  %v2612_v15 = vmul.f32 0.70710677, %v2589_v62 }
 0x177   : > { %1996 = vrcp.f32 %v717_v60  ;;  %vm588_vm2 = vcmp.lt.f32.partialorder %v2549_v30, 0.0  ;;  %v2617_v17 = vmul.f32 0.5, %v454_v25  ;;  %v2620_v18 = vand.u32 2147483647, %v2603_v12  ;;  %v1985_v61 = vld [vmem:[#allocation7 + $0x38] sm:$0xff]  }
 0x178   : > { %v2581_v53 = vpop.eup %1986  ;;  %1998 = vpow2.f32 %v1162_v46  ;;  %v1166_v23 = vmul.f32 1.442695, %v1131_v4  ;;  %v1132_v24 = vmul.f32 %v1100_v11, %v652_v37  ;;  %v1101_v26 = vsub.f32 0.0, %v2570_v44  ;;  %1822 = vmatpush3.bf16.msra.mxu1 %v1985_v61 }
 0x179   : > { %v808_v59 = vmul.f32 1.0614054, %v2581_v53  ;;  %2000 = vrcp.f32 %v718_v6  ;;  %v2626_v28 = vmul.f32 0.5, %v2546_v27  ;;  %v687_v29 = vmul.f32 0.3275911, %v2620_v18 }
 0x17a   : > { %v2600_v8 = vpop.eup %1988  ;;  %2002 = vpow2.f32 %v1164_v0  ;;  %v2636_v33 = vsel %vm588_vm2, -1.0, %v3570_v40  ;;  %v2639_v35 = vand.u32 2147483647, %v2612_v15  ;;  %vm589_vm3 = vcmp.lt.f32.partialorder %v2551_v34, 0.0 }
 0x17b   : > { %v840_v3 = vadd.f32 -1.4531521, %v808_v59  ;;  %v2598_v7 = vpop.f32.mrb[12].mxu0  ;;  %v810_v13 = vmul.f32 1.0614054, %v2600_v8  ;;  %v2629_v25 = vpop.eup %1990  ;;  %v1102_v27 = vsub.f32 0.0, %v2579_v52  ;;  %v2647_v47 = vadd.f32 %v2559_v39, %v2529_v57 }
 0x17c   : > { %v2605_v5 = vpop.f32.mrb[13].mxu0  ;;  %3598 = vst [vmem:[#allocation16_spill] sm:$0xff] %v2629_v25  ;;  %v2641_v37 = vpop.eup %1992  ;;  %v719_v46 = vadd.f32 1.0, %v687_v29  ;;  %2004 = vrcp.f32 %v715_v9  ;;  %v688_v30 = vmul.f32 0.3275911, %v2639_v35  ;;  %v1133_v59 = vmul.f32 %v1101_v26, %v2570_v44 }
 0x17d   : > { %v872_v10 = vmul.f32 %v2581_v53, %v840_v3  ;;  %v2614_v16 = vpop.f32.mrb[14].mxu0  ;;  %v842_v22 = vadd.f32 -1.4531521, %v810_v13  ;;  %v1168_v55 = vmul.f32 1.442695, %v1132_v24  ;;  %vm590_vm4 = vcmp.lt.f32.partialorder %v2557_v38, 0.0 }
 0x17e   : > { %v2622_v20 = vpop.f32.mrb[15].mxu0  ;;  %2006 = vrcp.f32 %v719_v46  ;;  %v720_v6 = vadd.f32 1.0, %v688_v30  ;;  %v2668_v44 = vsel %vm589_vm3, -1.0, %v3570_v40  ;;  %v2672_v13 = vmul.f32 0.70710677, %v2647_v47 }
 0x17f   : > { %v904_v21 = vadd.f32 1.4214138, %v872_v10  ;;  %v874_v32 = vmul.f32 %v2600_v8, %v842_v22  ;;  %2008 = vpow2.f32 %v1166_v23  ;;  %v1134_v26 = vmul.f32 %v1102_v27, %v2579_v52 }
 0x180   : > { %v2650_v54 = vpop.eup %1994  ;;  %2010 = vrcp.f32 %v720_v6  ;;  %v2682_v34 = vsel %vm590_vm4, -1.0, %v3570_v40  ;;  %v2692_v27 = vmul.f32 0.5, %v2589_v62  ;;  %vm591_vm5 = vcmp.lt.f32.partialorder %v2603_v12, 0.0 }
 0x181   : > { %v936_v31 = vmul.f32 %v2581_v53, %v904_v21  ;;  %v906_v51 = vadd.f32 1.4214138, %v874_v32  ;;  %v2656_v39 = vpop.eup %1996  ;;  %v812_v4 = vmul.f32 1.0614054, %v2650_v54  ;;  %v2685_v32 = vmul.f32 0.5, %v2584_v58 }
 0x182   : > { %v2663_v11 = vpop.eup %1998  ;;  %v813_v10 = vmul.f32 1.0614054, %v2656_v39  ;;  %v2700_v58 = vand.u32 2147483647, %v2672_v13  ;;  %2012 = vpow2.f32 %v1168_v55  ;;  %v1103_v62 = vsub.f32 0.0, %v2620_v18 }
 0x183   : > { %v968_v50 = vadd.f32 -0.28449672, %v936_v31  ;;  %v2654_v60 = vpop.f32.mrb[16].mxu0  ;;  %v938_v3 = vmul.f32 %v2600_v8, %v906_v51  ;;  %3599 = vst [vmem:[#allocation17_spill] sm:$0xff] %v2663_v11  ;;  %v844_v24 = vadd.f32 -1.4531521, %v812_v4  ;;  %v2677_v29 = vpop.eup %2000  ;;  %v468_v19 = vadd.f32 %v2575_v49, %v2529_v57 }
 0x184   : > { %v2661_v9 = vpop.f32.mrb[17].mxu0  ;;  %v845_v23 = vadd.f32 -1.4531521, %v813_v10  ;;  %v1170_v31 = vmul.f32 1.442695, %v1133_v59  ;;  %v2687_v46 = vpop.eup %2002  ;;  %vm592_vm6 = vcmp.lt.f32.partialorder %v2612_v15, 0.0  ;;  %v2764_v49 = vadd.f32 %v2598_v7, %v2527_v56 }
 0x185   : > { %v1000_v0 = vmul.f32 %v2581_v53, %v968_v50  ;;  %v2674_v21 = vpop.f32.mrb[18].mxu0  ;;  %v970_v22 = vadd.f32 -0.28449672, %v938_v3  ;;  %v876_v50 = vmul.f32 %v2650_v54, %v844_v24  ;;  %v814_v52 = vmul.f32 1.0614054, %v2677_v29 }
 0x186   : > { %v2694_v51 = vpop.f32.mrb[19].mxu0  ;;  %v877_v38 = vmul.f32 %v2656_v39, %v845_v23  ;;  %2014 = vpow2.f32 %v1170_v31  ;;  %v689_v4 = vmul.f32 0.3275911, %v2700_v58  ;;  %v2704_v6 = vpop.eup %2004  ;;  %v2710_v24 = vsel %vm591_vm5, -1.0, %v3570_v40 }
 0x187   : > { %v1032_v48 = vadd.f32 0.2548296, %v1000_v0  ;;  %v1002_v30 = vmul.f32 %v2600_v8, %v970_v22  ;;  %v908_v59 = vadd.f32 1.4214138, %v876_v50  ;;  %v846_v61 = vadd.f32 -1.4531521, %v814_v52 }
 0x188   : > { %v1172_v0 = vmul.f32 1.442695, %v1134_v26  ;;  %v909_v3 = vadd.f32 1.4214138, %v877_v38  ;;  %3600 = vst [vmem:[#allocation18_spill] sm:$0xff] %v2704_v6  ;;  %v2714_v26 = vpop.eup %2006  ;;  %v721_v50 = vadd.f32 1.0, %v689_v4  ;;  %v2719_v52 = vadd.f32 %v2572_v45, %v2527_v56 }
 0x189   : > { %v1064_v10 = vmul.f32 %v2581_v53, %v1032_v48  ;;  %v940_v22 = vmul.f32 %v2650_v54, %v908_v59  ;;  %v878_v12 = vmul.f32 %v2677_v29, %v846_v61  ;;  %v1034_v23 = vadd.f32 0.2548296, %v1002_v30  ;;  %v2726_v61 = vpop.eup %2008 }
 0x18a   : > { %v941_v31 = vmul.f32 %v2656_v39, %v909_v3  ;;  %2016 = vpow2.f32 %v1172_v0  ;;  %3601 = vst [vmem:[#allocation19_spill] sm:$0xff] %v2726_v61  ;;  %v815_v30 = vmul.f32 1.0614054, %v2714_v26  ;;  %v1135_v3 = vmul.f32 %v1103_v62, %v2620_v18  ;;  %v2730_v4 = vpop.eup %2010 }
 0x18b   : > { %v2712_v55 = vpop.f32.mrb[20].mxu0  ;;  %v972_v48 = vadd.f32 -0.28449672, %v940_v22  ;;  %v910_v38 = vadd.f32 1.4214138, %v878_v12  ;;  %2018 = vrcp.f32 %v721_v50  ;;  %v1224_v45 = vmul.f32 %v2641_v37, %v1064_v10 }
 0x18c   : > { %v2721_v53 = vpop.f32.mrb[21].mxu0  ;;  %v973_v40 = vadd.f32 -0.28449672, %v941_v31  ;;  %v1104_v12 = vsub.f32 0.0, %v2639_v35  ;;  %v847_v31 = vadd.f32 -1.4531521, %v815_v30  ;;  %v1066_v62 = vmul.f32 %v2600_v8, %v1034_v23  ;;  %v2013_v25 = vpop.eup %2012 }
 0x18d   : > { %v2724_v59 = vpop.f32.mrb[22].mxu0  ;;  %v1004_v22 = vmul.f32 %v2650_v54, %v972_v48  ;;  %v942_v0 = vmul.f32 %v2677_v29, %v910_v38  ;;  %v816_v61 = vmul.f32 1.0614054, %v2730_v4  ;;  %v2741_v18 = vmul.f32 0.70710677, %v2719_v52 }
 0x18e   : > { %v2736_v1 = vpop.f32.mrb[23].mxu0  ;;  %v1005_v42 = vmul.f32 %v2656_v39, %v973_v40  ;;  %v3603_v10 = vmov 1.0   ;;  %v879_v11 = vmul.f32 %v2714_v26, %v847_v31  ;;  %v1174_v40 = vmul.f32 1.442695, %v1135_v3 }
 0x18f   : > { %3602 = vst [vmem:[#allocation20_spill] sm:$0xff] %v2736_v1  ;;  %v1036_v50 = vadd.f32 0.2548296, %v1004_v22  ;;  %v974_v37 = vadd.f32 -0.28449672, %v942_v0  ;;  %v2747_v48 = vsel %vm592_vm6, -1.0, %v3603_v10  ;;  %v1136_v22 = vmul.f32 %v1104_v12, %v2639_v35 }
 0x190   : > { %v848_v30 = vadd.f32 -1.4531521, %v816_v61  ;;  %v1256_v8 = vsub.f32 1.0, %v1224_v45  ;;  %v1037_v23 = vadd.f32 0.2548296, %v1005_v42  ;;  %v1105_v15 = vsub.f32 0.0, %v2700_v58  ;;  %v2015_v2 = vpop.eup %2014 }
 0x191   : > { %v658_v61 = vand.u32 2147483647, %v2741_v18  ;;  %v1226_v42 = vmul.f32 %v2687_v46, %v1066_v62  ;;  %v1068_v35 = vmul.f32 %v2650_v54, %v1036_v50  ;;  %v1006_v45 = vmul.f32 %v2677_v29, %v974_v37 }
 0x192   : > { %v880_v31 = vmul.f32 %v2730_v4, %v848_v30  ;;  %v2772_v12 = vmul.f32 0.5, %v2647_v47  ;;  %2020 = vpow2.f32 %v1174_v40  ;;  %v1288_v7 = vmul.f32 %v1256_v8, %v2563_v41 }
 0x193   : > { %v2749_v38 = vpop.f32.mrb[24].mxu0  ;;  %v1176_v1 = vmul.f32 1.442695, %v1136_v22  ;;  %vm593_vm7 = vcmp.lt.f32.partialorder %v2672_v13, 0.0  ;;  %v1137_v46 = vmul.f32 %v1105_v15, %v2700_v58  ;;  %v1069_v54 = vmul.f32 %v2656_v39, %v1037_v23 }
 0x194   : > { %3604 = vst [vmem:[#allocation21_spill] sm:$0xff] %v2749_v38  ;;  %v2754_v6 = vpop.f32.mrb[25].mxu0  ;;  %v911_v38 = vadd.f32 1.4214138, %v879_v11  ;;  %v912_v30 = vadd.f32 1.4214138, %v880_v31  ;;  %v1228_v40 = vmul.f32 %v2013_v25, %v1068_v35 }
 0x195   : > { %3605 = vst [vmem:[#allocation22_spill] sm:$0xff] %v2754_v6  ;;  %v2758_v0 = vpop.f32.mrb[26].mxu0  ;;  %v2017_v6 = vpop.eup %2016  ;;  %v1038_v31 = vadd.f32 0.2548296, %v1006_v45  ;;  %v563_v22 = vmul.f32 0.70710677, %v468_v19  ;;  %v1229_v15 = vmul.f32 %v2015_v2, %v1069_v54 }
 0x196   : > { %3606 = vst [vmem:[#allocation23_spill] sm:$0xff] %v2758_v0  ;;  %v2766_v3 = vpop.f32.mrb[27].mxu0  ;;  %v943_v11 = vmul.f32 %v2714_v26, %v911_v38  ;;  %v690_v0 = vmul.f32 0.3275911, %v658_v61  ;;  %v2778_v62 = vpop.eup %2018  ;;  %v944_v47 = vmul.f32 %v2730_v4, %v912_v30  ;;  %v1258_v38 = vsub.f32 1.0, %v1226_v42 }
 0x197   : > { %3607 = vst [vmem:[#allocation24_spill] sm:$0xff] %v2766_v3  ;;  %v817_v3 = vmul.f32 1.0614054, %v2778_v62  ;;  %v2787_v58 = vsel %vm593_vm7, -1.0, %v3603_v10  ;;  %v2790_v23 = vmul.f32 0.5, %v2719_v52  ;;  %v1260_v35 = vsub.f32 1.0, %v1228_v40 }
 0x198   : > { %v975_v50 = vadd.f32 -0.28449672, %v943_v11  ;;  %v722_v37 = vadd.f32 1.0, %v690_v0  ;;  %v976_v8 = vadd.f32 -0.28449672, %v944_v47  ;;  %v1070_v45 = vmul.f32 %v2677_v29, %v1038_v31 }
 0x199   : > { %v849_v39 = vadd.f32 -1.4531521, %v817_v3  ;;  %v1178_v42 = vmul.f32 1.442695, %v1137_v46  ;;  %v1320_v30 = vadd.f32 1.0, %v1288_v7  ;;  %v1290_v13 = vmul.f32 %v1258_v38, %v2594_v63 }
 0x19a   : > { %v1007_v41 = vmul.f32 %v2714_v26, %v975_v50  ;;  %2022 = vrcp.f32 %v722_v37  ;;  %v1008_v0 = vmul.f32 %v2730_v4, %v976_v8  ;;  %v1106_v50 = vsub.f32 0.0, %v658_v61 }
 0x19b   : > { %2024 = vpow2.f32 %v1176_v1  ;;  %v881_v11 = vmul.f32 %v2778_v62, %v849_v39  ;;  %v2795_v1 = vmul.f32 0.5, %v468_v19  ;;  %v659_v3 = vand.u32 2147483647, %v563_v22 }
 0x19c   : > { %v1039_v25 = vadd.f32 0.2548296, %v1007_v41  ;;  %v1040_v47 = vadd.f32 0.2548296, %v1008_v0  ;;  %v2800_v54 = vmul.f32 0.70710677, %v2764_v49  ;;  %v2021_v46 = vpop.eup %2020  ;;  %2026 = vpow2.f32 %v1178_v42 }
 0x19d   : > { %v913_v2 = vadd.f32 1.4214138, %v881_v11  ;;  %v1261_v37 = vsub.f32 1.0, %v1229_v15  ;;  %vm594_vm8 = vcmp.lt.f32.partialorder %v2741_v18, 0.0  ;;  %v691_v29 = vmul.f32 0.3275911, %v659_v3 }
 0x19e   : > { %v1071_v52 = vmul.f32 %v2714_v26, %v1039_v25  ;;  %v1292_v19 = vmul.f32 %v1260_v35, %v2636_v33  ;;  %v1230_v7 = vmul.f32 %v2017_v6, %v1070_v45  ;;  %v660_v38 = vand.u32 2147483647, %v2800_v54 }
 0x19f   : > { %v945_v63 = vmul.f32 %v2778_v62, %v913_v2  ;;  %v2807_v26 = vmul.f32 %v1320_v30, %v2553_v36  ;;  %v1322_v40 = vadd.f32 1.0, %v1290_v13  ;;  %v1138_v31 = vmul.f32 %v1106_v50, %v658_v61 }
 0x1a0   : > { %v723_v41 = vadd.f32 1.0, %v691_v29  ;;  %v1231_v8 = vmul.f32 %v2021_v46, %v1071_v52  ;;  %v1072_v39 = vmul.f32 %v2730_v4, %v1040_v47  ;;  %v692_v25 = vmul.f32 0.3275911, %v660_v38 }
 0x1a1   : > { %v977_v15 = vadd.f32 -0.28449672, %v945_v63  ;;  %v1293_v33 = vmul.f32 %v1261_v37, %v2668_v44  ;;  %v2816_v6 = vsel %vm594_vm8, -1.0, %v3603_v10  ;;  %vm595_vm9 = vcmp.lt.f32.partialorder %v563_v22, 0.0 }
 0x1a2   : > { %2028 = vrcp.f32 %v723_v41  ;;  %v1324_v42 = vadd.f32 1.0, %v1292_v19  ;;  %v1262_v61 = vsub.f32 1.0, %v1230_v7  ;;  %v724_v45 = vadd.f32 1.0, %v692_v25 }
 0x1a3   : > { %v1009_v4 = vmul.f32 %v2778_v62, %v977_v15  ;;  %v1180_v11 = vmul.f32 1.442695, %v1138_v31  ;;  %v1107_v30 = vsub.f32 0.0, %v659_v3  ;;  %v474_v44 = vadd.f32 %v2605_v5, %v2529_v57 }
 0x1a4   : > { %v2810_v0 = vpop.eup %2022  ;;  %v1263_v13 = vsub.f32 1.0, %v1231_v8  ;;  %2030 = vrcp.f32 %v724_v45  ;;  %v2823_v52 = vmul.f32 %v1322_v40, %v2567_v43  ;;  %v1325_v47 = vadd.f32 1.0, %v1293_v33 }
 0x1a5   : > { %v2025_v36 = vpop.eup %2024  ;;  %v818_v35 = vmul.f32 1.0614054, %v2810_v0  ;;  %v2827_v2 = vsel %vm595_vm9, -1.0, %v3603_v10  ;;  %v2829_v46 = vmul.f32 0.70710677, %v474_v44  ;;  %v2832_v37 = vmul.f32 %v1324_v42, %v2609_v14 }
 0x1a6   : > { %v1232_v50 = vmul.f32 %v2025_v36, %v1072_v39  ;;  %v1294_v29 = vmul.f32 %v1262_v61, %v2682_v34  ;;  %v2838_v19 = vadd.f32 %v2614_v16, %v2527_v56  ;;  %v2027_v43 = vpop.eup %2026  ;;  %v1041_v7 = vadd.f32 0.2548296, %v1009_v4 }
 0x1a7   : > { %v850_v18 = vadd.f32 -1.4531521, %v818_v35  ;;  %3608 = vst [vmem:[#allocation25_spill] sm:$0xff] %v2832_v37  ;;  %2032 = vpow2.f32 %v1180_v11  ;;  %v1139_v63 = vmul.f32 %v1107_v30, %v659_v3  ;;  %v2841_v22 = vand.u32 2147483647, %v2829_v46 }
 0x1a8   : > { %v1295_v40 = vmul.f32 %v1263_v13, %v2710_v24  ;;  %v1264_v31 = vsub.f32 1.0, %v1232_v50  ;;  %v1108_v41 = vsub.f32 0.0, %v660_v38  ;;  %v2845_v34 = vmul.f32 %v1325_v47, %v2617_v17 }
 0x1a9   : > { %v882_v5 = vmul.f32 %v2810_v0, %v850_v18  ;;  %v693_v8 = vmul.f32 0.3275911, %v2841_v22  ;;  %v2849_v16 = vmul.f32 0.70710677, %v2838_v19  ;;  %v2853_v39 = vadd.f32 %v2622_v20, %v2529_v57 }
 0x1aa   : > { %v1326_v3 = vadd.f32 1.0, %v1294_v29  ;;  %v2857_v24 = vmul.f32 0.5, %v2764_v49  ;;  %vm596_vm10 = vcmp.lt.f32.partialorder %v2800_v54, 0.0  ;;  %v1073_v17 = vmul.f32 %v2778_v62, %v1041_v7 }
 0x1ab   : > { %v914_v14 = vadd.f32 1.4214138, %v882_v5  ;;  %v1182_v33 = vmul.f32 1.442695, %v1139_v63  ;;  %v725_v36 = vadd.f32 1.0, %v693_v8  ;;  %v1327_v61 = vadd.f32 1.0, %v1295_v40 }
 0x1ac   : > { %v2860_v25 = vpop.eup %2028  ;;  %v662_v42 = vand.u32 2147483647, %v2849_v16  ;;  %v1296_v20 = vmul.f32 %v1264_v31, %v2747_v48  ;;  %v1140_v45 = vmul.f32 %v1108_v41, %v660_v38  ;;  %v2867_v11 = vmul.f32 0.70710677, %v2853_v39  ;;  %v2883_v38 = vpop.f32.mrb[28].mxu0 }
 0x1ad   : > { %v946_v15 = vmul.f32 %v2810_v0, %v914_v14  ;;  %v819_v35 = vmul.f32 1.0614054, %v2860_v25  ;;  %2034 = vrcp.f32 %v725_v36  ;;  %v2872_v62 = vmul.f32 %v1326_v3, %v2626_v28 }
 0x1ae   : > { %v694_v49 = vmul.f32 0.3275911, %v662_v42  ;;  %v2869_v30 = vpop.eup %2030  ;;  %v2877_v50 = vsel %vm596_vm10, -1.0, %v3603_v10  ;;  %v2881_v48 = vadd.f32 %v2654_v60, %v2527_v56  ;;  %v1233_v18 = vmul.f32 %v2027_v43, %v1073_v17  ;;  %v2903_v17 = vpop.f32.mrb[29].mxu0 }
 0x1af   : > { %v978_v4 = vadd.f32 -0.28449672, %v946_v15  ;;  %3609 = vst [vmem:[#allocation26_spill] sm:$0xff] %v2872_v62  ;;  %v851_v13 = vadd.f32 -1.4531521, %v819_v35  ;;  %2036 = vpow2.f32 %v1182_v33  ;;  %v2887_v28 = vmul.f32 %v1327_v61, %v2685_v32  ;;  %v2907_v61 = vpop.f32.mrb[30].mxu0 }
 0x1b0   : > { %v820_v47 = vmul.f32 1.0614054, %v2869_v30  ;;  %v726_v29 = vadd.f32 1.0, %v694_v49  ;;  %v1328_v5 = vadd.f32 1.0, %v1296_v20  ;;  %v1184_v54 = vmul.f32 1.442695, %v1140_v45 }
 0x1b1   : > { %v883_v7 = vmul.f32 %v2860_v25, %v851_v13  ;;  %v2033_v63 = vpop.eup %2032  ;;  %v1010_v40 = vmul.f32 %v2810_v0, %v978_v4  ;;  %v2892_v60 = vand.u32 2147483647, %v2867_v11  ;;  %v2894_v14 = vmul.f32 0.5, %v474_v44  ;;  %v2912_v49 = vpop.f32.mrb[31].mxu0 }
 0x1b2   : > { %v852_v31 = vadd.f32 -1.4531521, %v820_v47  ;;  %2038 = vrcp.f32 %v726_v29  ;;  %v1109_v41 = vsub.f32 0.0, %v2841_v22  ;;  %v2898_v32 = vmul.f32 0.70710677, %v2881_v48 }
 0x1b3   : > { %v915_v43 = vadd.f32 1.4214138, %v883_v7  ;;  %v1265_v8 = vsub.f32 1.0, %v1233_v18  ;;  %vm597_vm11 = vcmp.lt.f32.partialorder %v2829_v46, 0.0  ;;  %v695_v15 = vmul.f32 0.3275911, %v2892_v60 }
 0x1b4   : > { %v884_v3 = vmul.f32 %v2869_v30, %v852_v31  ;;  %2040 = vpow2.f32 %v1184_v54  ;;  %v1110_v36 = vsub.f32 0.0, %v662_v42  ;;  %v664_v44 = vand.u32 2147483647, %v2898_v32 }
 0x1b5   : > { %v947_v33 = vmul.f32 %v2860_v25, %v915_v43  ;;  %v2910_v20 = vmul.f32 %v1328_v5, %v2692_v27  ;;  %v1042_v35 = vadd.f32 0.2548296, %v1010_v40  ;;  %v727_v4 = vadd.f32 1.0, %v695_v15 }
 0x1b6   : > { %v916_v45 = vadd.f32 1.4214138, %v884_v3  ;;  %v2915_v13 = vsel %vm597_vm11, -1.0, %v3603_v10  ;;  %v1141_v18 = vmul.f32 %v1109_v41, %v2841_v22  ;;  %v696_v47 = vmul.f32 0.3275911, %v664_v44 }
 0x1b7   : > { %3610 = vst [vmem:[#allocation27_spill] sm:$0xff] %v2910_v20  ;;  %v979_v46 = vadd.f32 -0.28449672, %v947_v33  ;;  %v2918_v29 = vpop.eup %2034  ;;  %v1297_v7 = vmul.f32 %v1265_v8, %v2787_v58  ;;  %2042 = vrcp.f32 %v727_v4  ;;  %v2924_v27 = vadd.f32 %v2661_v9, %v2529_v57 }
 0x1b8   : > { %v948_v54 = vmul.f32 %v2869_v30, %v916_v45  ;;  %v821_v5 = vmul.f32 1.0614054, %v2918_v29  ;;  %vm598_vm12 = vcmp.lt.f32.partialorder %v2849_v16, 0.0  ;;  %v1142_v40 = vmul.f32 %v1110_v36, %v662_v42 }
 0x1b9   : > { %v728_v31 = vadd.f32 1.0, %v696_v47  ;;  %v2037_v43 = vpop.eup %2036  ;;  %v1074_v22 = vmul.f32 %v2810_v0, %v1042_v35  ;;  %v2930_v3 = vmul.f32 0.5, %v2838_v19  ;;  %v2933_v58 = vmul.f32 0.5, %v2853_v39 }
 0x1ba   : > { %v980_v41 = vadd.f32 -0.28449672, %v948_v54  ;;  %v1011_v8 = vmul.f32 %v2860_v25, %v979_v46  ;;  %v853_v9 = vadd.f32 -1.4531521, %v821_v5  ;;  %v1186_v15 = vmul.f32 1.442695, %v1141_v18 }
 0x1bb   : > { %2044 = vrcp.f32 %v728_v31  ;;  %v1329_v16 = vadd.f32 1.0, %v1297_v7  ;;  %v2939_v42 = vsel %vm598_vm12, -1.0, %v3603_v10  ;;  %vm599_vm13 = vcmp.lt.f32.partialorder %v2867_v11, 0.0 }
 0x1bc   : > { %v2936_v33 = vpop.eup %2038  ;;  %v2943_v0 = vmul.f32 0.70710677, %v2924_v27  ;;  %v885_v19 = vmul.f32 %v2918_v29, %v853_v9  ;;  %v1188_v36 = vmul.f32 1.442695, %v1142_v40  ;;  %v1111_v35 = vsub.f32 0.0, %v2892_v60 }
 0x1bd   : > { %v822_v39 = vmul.f32 1.0614054, %v2936_v33  ;;  %v1234_v45 = vmul.f32 %v2033_v63, %v1074_v22  ;;  %v1012_v4 = vmul.f32 %v2869_v30, %v980_v41  ;;  %v1112_v46 = vsub.f32 0.0, %v664_v44 }
 0x1be   : > { %v2950_v18 = vand.u32 2147483647, %v2943_v0  ;;  %v2041_v47 = vpop.eup %2040  ;;  %v1043_v7 = vadd.f32 0.2548296, %v1011_v8  ;;  %v917_v54 = vadd.f32 1.4214138, %v885_v19  ;;  %2046 = vpow2.f32 %v1186_v15 }
 0x1bf   : > { %v854_v5 = vadd.f32 -1.4531521, %v822_v39  ;;  %v2953_v31 = vmul.f32 %v1329_v16, %v2772_v12  ;;  %v2958_v40 = vsel %vm599_vm13, -1.0, %v3603_v10  ;;  %v2963_v22 = vadd.f32 %v2674_v21, %v2527_v56 }
 0x1c0   : > { %v697_v63 = vmul.f32 0.3275911, %v2950_v18  ;;  %v949_v41 = vmul.f32 %v2918_v29, %v917_v54  ;;  %2048 = vpow2.f32 %v1188_v36  ;;  %v1143_v9 = vmul.f32 %v1111_v35, %v2892_v60 }
 0x1c1   : > { %3611 = vst [vmem:[#allocation28_spill] sm:$0xff] %v2953_v31  ;;  %v886_v8 = vmul.f32 %v2936_v33, %v854_v5  ;;  %v2968_v12 = vpop.eup %2042  ;;  %v1266_v15 = vsub.f32 1.0, %v1234_v45  ;;  %v1044_v16 = vadd.f32 0.2548296, %v1012_v4  ;;  %v1144_v11 = vmul.f32 %v1112_v46, %v664_v44 }
 0x1c2   : > { %v729_v19 = vadd.f32 1.0, %v697_v63  ;;  %v1075_v39 = vmul.f32 %v2860_v25, %v1043_v7  ;;  %v981_v20 = vadd.f32 -0.28449672, %v949_v41  ;;  %v823_v21 = vmul.f32 1.0614054, %v2968_v12 }
 0x1c3   : > { %v918_v31 = vadd.f32 1.4214138, %v886_v8  ;;  %v2973_v62 = vmul.f32 0.5, %v2881_v48  ;;  %vm600_vm14 = vcmp.lt.f32.partialorder %v2898_v32, 0.0  ;;  %v2977_v60 = vmul.f32 0.70710677, %v2963_v22 }
 0x1c4   : > { %2050 = vrcp.f32 %v729_v19  ;;  %v1013_v44 = vmul.f32 %v2918_v29, %v981_v20  ;;  %v855_v25 = vadd.f32 -1.4531521, %v823_v21  ;;  %v2985_v45 = vadd.f32 %v2694_v51, %v2529_v57 }
 0x1c5   : > { %v2979_v36 = vpop.eup %2044  ;;  %v950_v35 = vmul.f32 %v2936_v33, %v918_v31  ;;  %v1298_v48 = vmul.f32 %v1266_v15, %v2816_v6  ;;  %v1190_v4 = vmul.f32 1.442695, %v1143_v9  ;;  %v1192_v7 = vmul.f32 1.442695, %v1144_v11 }
 0x1c6   : > { %v824_v46 = vmul.f32 1.0614054, %v2979_v36  ;;  %v1235_v54 = vmul.f32 %v2037_v43, %v1075_v39  ;;  %v1076_v5 = vmul.f32 %v2869_v30, %v1044_v16  ;;  %v887_v41 = vmul.f32 %v2968_v12, %v855_v25 }
 0x1c7   : > { %v982_v63 = vadd.f32 -0.28449672, %v950_v35  ;;  %v2994_v20 = vsel %vm600_vm14, -1.0, %v3603_v10  ;;  %v1113_v51 = vsub.f32 0.0, %v2950_v18  ;;  %v2998_v6 = vand.u32 2147483647, %v2977_v60 }
 0x1c8   : > { %v856_v31 = vadd.f32 -1.4531521, %v824_v46  ;;  %v2047_v8 = vpop.eup %2046  ;;  %v1045_v9 = vadd.f32 0.2548296, %v1013_v44  ;;  %v919_v15 = vadd.f32 1.4214138, %v887_v41  ;;  %2052 = vpow2.f32 %v1190_v4 }
 0x1c9   : > { %v1014_v43 = vmul.f32 %v2936_v33, %v982_v63  ;;  %v3002_v30 = vmul.f32 0.70710677, %v2985_v45  ;;  %v1330_v16 = vadd.f32 1.0, %v1298_v48  ;;  %v698_v11 = vmul.f32 0.3275911, %v2998_v6 }
 0x1ca   : > { %v888_v32 = vmul.f32 %v2979_v36, %v856_v31  ;;  %v2049_v19 = vpop.eup %2048  ;;  %v1267_v39 = vsub.f32 1.0, %v1235_v54  ;;  %v1236_v21 = vmul.f32 %v2041_v47, %v1076_v5  ;;  %v951_v35 = vmul.f32 %v2968_v12, %v919_v15 }
 0x1cb   : > { %v3008_v25 = vmul.f32 0.5, %v2924_v27  ;;  %v1046_v44 = vadd.f32 0.2548296, %v1014_v43  ;;  %2054 = vpow2.f32 %v1192_v7  ;;  %v730_v63 = vadd.f32 1.0, %v698_v11 }
 0x1cc   : > { %v920_v46 = vadd.f32 1.4214138, %v888_v32  ;;  %v1077_v41 = vmul.f32 %v2918_v29, %v1045_v9  ;;  %v983_v48 = vadd.f32 -0.28449672, %v951_v35  ;;  %v1145_v4 = vmul.f32 %v1113_v51, %v2950_v18 }
 0x1cd   : > { %v667_v31 = vand.u32 2147483647, %v3002_v30  ;;  %v3016_v47 = vmul.f32 %v1330_v16, %v2790_v23  ;;  %vm601_vm15 = vcmp.lt.f32.partialorder %v2943_v0, 0.0  ;;  %2056 = vrcp.f32 %v730_v63 }
 0x1ce   : > { %v3013_v37 = vpop.eup %2050  ;;  %v952_v54 = vmul.f32 %v2979_v36, %v920_v46  ;;  %v1299_v27 = vmul.f32 %v1267_v39, %v2827_v2  ;;  %v1268_v7 = vsub.f32 1.0, %v1236_v21  ;;  %v1015_v29 = vmul.f32 %v2968_v12, %v983_v48 }
 0x1cf   : > { %v825_v5 = vmul.f32 1.0614054, %v3013_v37  ;;  %v1078_v18 = vmul.f32 %v2936_v33, %v1046_v44  ;;  %v699_v9 = vmul.f32 0.3275911, %v667_v31  ;;  %v3026_v23 = vadd.f32 %v2712_v55, %v2527_v56 }
 0x1d0   : > { %v984_v51 = vadd.f32 -0.28449672, %v952_v54  ;;  %v1237_v43 = vmul.f32 %v2047_v8, %v1077_v41  ;;  %v3029_v15 = vsel %vm601_vm15, -1.0, %v3603_v10  ;;  %v1194_v16 = vmul.f32 1.442695, %v1145_v4 }
 0x1d1   : > { %v857_v0 = vadd.f32 -1.4531521, %v825_v5  ;;  %v1047_v2 = vadd.f32 0.2548296, %v1015_v29  ;;  %v3032_v32 = vmul.f32 0.5, %v2963_v22  ;;  %vm602_vm0 = vcmp.lt.f32.partialorder %v2977_v60, 0.0 }
 0x1d2   : > { %v731_v11 = vadd.f32 1.0, %v699_v9  ;;  %v1331_v33 = vadd.f32 1.0, %v1299_v27  ;;  %v1300_v39 = vmul.f32 %v1268_v7, %v2877_v50  ;;  %v1114_v55 = vsub.f32 0.0, %v2998_v6  ;;  %v2053_v8 = vpop.eup %2052 }
 0x1d3   : > { %v889_v21 = vmul.f32 %v3013_v37, %v857_v0  ;;  %v1238_v35 = vmul.f32 %v2049_v19, %v1078_v18  ;;  %v1016_v44 = vmul.f32 %v2979_v36, %v984_v51  ;;  %v3040_v46 = vmul.f32 0.70710677, %v3026_v23 }
 0x1d4   : > { %2058 = vrcp.f32 %v731_v11  ;;  %v1269_v22 = vsub.f32 1.0, %v1237_v43  ;;  %v3044_v41 = vadd.f32 %v2721_v53, %v2529_v57  ;;  %v1079_v48 = vmul.f32 %v2968_v12, %v1047_v2 }
 0x1d5   : > { %v921_v63 = vadd.f32 1.4214138, %v889_v21  ;;  %2060 = vpow2.f32 %v1194_v16  ;;  %v2055_v50 = vpop.eup %2054  ;;  %v3050_v19 = vsel %vm602_vm0, -1.0, %v3603_v10  ;;  %v1115_v4 = vsub.f32 0.0, %v667_v31 }
 0x1d6   : > { %v668_v54 = vand.u32 2147483647, %v3040_v46  ;;  %v3054_v27 = vmul.f32 %v1331_v33, %v2795_v1  ;;  %v1332_v7 = vadd.f32 1.0, %v1300_v39  ;;  %v1146_v53 = vmul.f32 %v1114_v55, %v2998_v6 }
 0x1d7   : > { %v953_v29 = vmul.f32 %v3013_v37, %v921_v63  ;;  %v3058_v5 = vpop.eup %2056  ;;  %v1270_v18 = vsub.f32 1.0, %v1238_v35  ;;  %v1048_v12 = vadd.f32 0.2548296, %v1016_v44  ;;  %vm603_vm1 = vcmp.lt.f32.partialorder %v3002_v30, 0.0 }
 0x1d8   : > { %v700_v60 = vmul.f32 0.3275911, %v668_v54  ;;  %v1301_v51 = vmul.f32 %v1269_v22, %v2915_v13  ;;  %v826_v43 = vmul.f32 1.0614054, %v3058_v5  ;;  %v3064_v1 = vmul.f32 0.70710677, %v3044_v41 }
 0x1d9   : > { %v985_v9 = vadd.f32 -0.28449672, %v953_v29  ;;  %v1239_v0 = vmul.f32 %v2053_v8, %v1079_v48  ;;  %v1147_v16 = vmul.f32 %v1115_v4, %v667_v31  ;;  %v3068_v6 = vadd.f32 %v2724_v59, %v2527_v56 }
 0x1da   : > { %v732_v2 = vadd.f32 1.0, %v700_v60  ;;  %v3071_v11 = vmul.f32 %v1332_v7, %v2857_v24  ;;  %v858_v33 = vadd.f32 -1.4531521, %v826_v43  ;;  %v1196_v39 = vmul.f32 1.442695, %v1146_v53 }
 0x1db   : > { %v3074_v13 = vmul.f32 0.5, %v2985_v45  ;;  %v1302_v21 = vmul.f32 %v1270_v18, %v2939_v42  ;;  %v1017_v55 = vmul.f32 %v3013_v37, %v985_v9  ;;  %v3081_v31 = vsel %vm603_vm1, -1.0, %v3603_v10 }
 0x1dc   : > { %2062 = vrcp.f32 %v732_v2  ;;  %v1333_v59 = vadd.f32 1.0, %v1301_v51  ;;  %v1080_v8 = vmul.f32 %v2979_v36, %v1048_v12  ;;  %v890_v24 = vmul.f32 %v3058_v5, %v858_v33 }
 0x1dd   : > { %v3086_v35 = vand.u32 2147483647, %v3064_v1  ;;  %v1271_v44 = vsub.f32 1.0, %v1239_v0  ;;  %v1198_v42 = vmul.f32 1.442695, %v1147_v16  ;;  %v1116_v22 = vsub.f32 0.0, %v668_v54 }
 0x1de   : > { %v3088_v45 = vpop.eup %2058  ;;  %v3091_v63 = vmul.f32 0.70710677, %v3068_v6  ;;  %v922_v48 = vadd.f32 1.4214138, %v890_v24  ;;  %2064 = vpow2.f32 %v1196_v39  ;;  %v1334_v7 = vadd.f32 1.0, %v1302_v21  ;;  %v3612_v21 = vld [vmem:[#allocation20_spill] sm:$0xff] }
 0x1df   : > { %v2061_v30 = vpop.eup %2060  ;;  %v827_v4 = vmul.f32 1.0614054, %v3088_v45  ;;  %v701_v36 = vmul.f32 0.3275911, %v3086_v35  ;;  %v1049_v29 = vadd.f32 0.2548296, %v1017_v55  ;;  %v1240_v12 = vmul.f32 %v2055_v50, %v1080_v8 }
 0x1e0   : > { %v3096_v53 = vmul.f32 0.5, %v3026_v23  ;;  %v3099_v18 = vand.u32 2147483647, %v3091_v63  ;;  %v954_v60 = vmul.f32 %v3058_v5, %v922_v48  ;;  %v3103_v43 = vmul.f32 %v1333_v59, %v2894_v14  ;;  %v3614_v48 = vld [vmem:[#allocation21_spill] sm:$0xff] }
 0x1e1   : > { %v859_v51 = vadd.f32 -1.4531521, %v827_v4  ;;  %v733_v9 = vadd.f32 1.0, %v701_v36  ;;  %v1303_v0 = vmul.f32 %v1271_v44, %v2958_v40  ;;  %vm604_vm2 = vcmp.lt.f32.partialorder %v3040_v46, 0.0 }
 0x1e2   : > { %v702_v16 = vmul.f32 0.3275911, %v3099_v18  ;;  %v986_v2 = vadd.f32 -0.28449672, %v954_v60  ;;  %v1148_v33 = vmul.f32 %v1116_v22, %v668_v54  ;;  %v1081_v50 = vmul.f32 %v3013_v37, %v1049_v29 }
 0x1e3   : > { %v891_v23 = vmul.f32 %v3088_v45, %v859_v51  ;;  %2066 = vrcp.f32 %v733_v9  ;;  %v3112_v55 = vadd.f32 %v3612_v21, %v2529_v57  ;;  %v3115_v14 = vmul.f32 %v1334_v7, %v2930_v3  ;;  %v3615_v21 = vld [vmem:[#allocation22_spill] sm:$0xff] }
 0x1e4   : > { %2068 = vpow2.f32 %v1198_v42  ;;  %v734_v39 = vadd.f32 1.0, %v702_v16  ;;  %v1272_v40 = vsub.f32 1.0, %v1240_v12  ;;  %v1018_v59 = vmul.f32 %v3058_v5, %v986_v2 }
 0x1e5   : > { %3613 = vst [vmem:[#allocation20_spill] sm:$0xff] %v3115_v14  ;;  %v923_v8 = vadd.f32 1.4214138, %v891_v23  ;;  %v1335_v44 = vadd.f32 1.0, %v1303_v0  ;;  %v3123_v37 = vsel %vm604_vm2, -1.0, %v3603_v10  ;;  %vm605_vm3 = vcmp.lt.f32.partialorder %v3064_v1, 0.0 }
 0x1e6   : > { %v3118_v24 = vpop.eup %2062  ;;  %v3127_v54 = vmul.f32 0.70710677, %v3112_v55  ;;  %v1200_v22 = vmul.f32 1.442695, %v1148_v33  ;;  %v3133_v4 = vadd.f32 %v3614_v48, %v2527_v56  ;;  %v1241_v36 = vmul.f32 %v2061_v30, %v1081_v50 }
 0x1e7   : > { %v955_v3 = vmul.f32 %v3088_v45, %v923_v8  ;;  %v828_v42 = vmul.f32 1.0614054, %v3118_v24  ;;  %v1050_v7 = vadd.f32 0.2548296, %v1018_v59  ;;  %2070 = vrcp.f32 %v734_v39 }
 0x1e8   : > { %v3136_v46 = vand.u32 2147483647, %v3127_v54  ;;  %v2065_v29 = vpop.eup %2064  ;;  %v1304_v12 = vmul.f32 %v1272_v40, %v2994_v20  ;;  %v1117_v9 = vsub.f32 0.0, %v3086_v35  ;;  %v3141_v0 = vmul.f32 %v1335_v44, %v2933_v58 }
 0x1e9   : > { %v987_v60 = vadd.f32 -0.28449672, %v955_v3  ;;  %v860_v51 = vadd.f32 -1.4531521, %v828_v42  ;;  %v3144_v16 = vmul.f32 0.5, %v3044_v41  ;;  %v3149_v30 = vsel %vm605_vm3, -1.0, %v3603_v10 }
 0x1ea   : > { %v703_v2 = vmul.f32 0.3275911, %v3136_v46  ;;  %v1118_v33 = vsub.f32 0.0, %v3099_v18  ;;  %v3156_v50 = vmul.f32 0.70710677, %v3133_v4  ;;  %v1273_v58 = vsub.f32 1.0, %v1241_v36 }
 0x1eb   : > { %v1019_v23 = vmul.f32 %v3088_v45, %v987_v60  ;;  %v892_v20 = vmul.f32 %v3118_v24, %v860_v51  ;;  %v1082_v41 = vmul.f32 %v3058_v5, %v1050_v7  ;;  %v3161_v1 = vadd.f32 %v3615_v21, %v2529_v57 }
 0x1ec   : > { %v735_v39 = vadd.f32 1.0, %v703_v2  ;;  %v1336_v59 = vadd.f32 1.0, %v1304_v12  ;;  %2072 = vpow2.f32 %v1200_v22  ;;  %v1149_v44 = vmul.f32 %v1117_v9, %v3086_v35 }
 0x1ed   : > { %v3163_v40 = vpop.eup %2066  ;;  %v924_v8 = vadd.f32 1.4214138, %v892_v20  ;;  %v1051_v42 = vadd.f32 0.2548296, %v1019_v23  ;;  %v3168_v36 = vmul.f32 0.5, %v3068_v6  ;;  %vm606_vm4 = vcmp.lt.f32.partialorder %v3091_v63, 0.0 }
 0x1ee   : > { %v2069_v3 = vpop.eup %2068  ;;  %v829_v48 = vmul.f32 1.0614054, %v3163_v40  ;;  %2074 = vrcp.f32 %v735_v39  ;;  %v1150_v7 = vmul.f32 %v1118_v33, %v3099_v18  ;;  %v672_v12 = vand.u32 2147483647, %v3156_v50 }
 0x1ef   : > { %v956_v5 = vmul.f32 %v3118_v24, %v924_v8  ;;  %v1305_v22 = vmul.f32 %v1273_v58, %v3029_v15  ;;  %v1242_v60 = vmul.f32 %v2065_v29, %v1082_v41  ;;  %v3176_v51 = vmul.f32 0.70710677, %v3161_v1 }
 0x1f0   : > { %v861_v35 = vadd.f32 -1.4531521, %v829_v48  ;;  %v3179_v9 = vmul.f32 %v1336_v59, %v2973_v62  ;;  %v1202_v2 = vmul.f32 1.442695, %v1149_v44  ;;  %v704_v23 = vmul.f32 0.3275911, %v672_v12 }
 0x1f1   : > { %v988_v6 = vadd.f32 -0.28449672, %v956_v5  ;;  %v3181_v20 = vpop.eup %2070  ;;  %v1083_v63 = vmul.f32 %v3088_v45, %v1051_v42  ;;  %v3186_v33 = vsel %vm606_vm4, -1.0, %v3603_v10  ;;  %v673_v15 = vand.u32 2147483647, %v3176_v51 }
 0x1f2   : > { %3616 = vst [vmem:[#allocation21_spill] sm:$0xff] %v3179_v9  ;;  %v893_v18 = vmul.f32 %v3163_v40, %v861_v35  ;;  %v830_v58 = vmul.f32 1.0614054, %v3181_v20  ;;  %v1204_v62 = vmul.f32 1.442695, %v1150_v7  ;;  %v1119_v41 = vsub.f32 0.0, %v3136_v46 }
 0x1f3   : > { %v1020_v29 = vmul.f32 %v3118_v24, %v988_v6  ;;  %v1337_v39 = vadd.f32 1.0, %v1305_v22  ;;  %v1274_v21 = vsub.f32 1.0, %v1242_v60  ;;  %v736_v8 = vadd.f32 1.0, %v704_v23  ;;  %v3617_v35 = vld [vmem:[#allocation23_spill] sm:$0xff] }
 0x1f4   : > { %v925_v59 = vadd.f32 1.4214138, %v893_v18  ;;  %2076 = vpow2.f32 %v1202_v2  ;;  %v862_v45 = vadd.f32 -1.4531521, %v830_v58  ;;  %v705_v42 = vmul.f32 0.3275911, %v673_v15 }
 0x1f5   : > { %v1052_v44 = vadd.f32 0.2548296, %v1020_v29  ;;  %v1243_v48 = vmul.f32 %v2069_v3, %v1083_v63  ;;  %2078 = vrcp.f32 %v736_v8  ;;  %v506_v6 = vadd.f32 %v3617_v35, %v2527_v56 }
 0x1f6   : > { %v957_v5 = vmul.f32 %v3163_v40, %v925_v59  ;;  %v2073_v9 = vpop.eup %2072  ;;  %v3196_v7 = vmul.f32 0.5, %v3112_v55  ;;  %v1151_v22 = vmul.f32 %v1119_v41, %v3136_v46  ;;  %v1120_v60 = vsub.f32 0.0, %v672_v12 }
 0x1f7   : > { %v737_v18 = vadd.f32 1.0, %v705_v42  ;;  %v3202_v2 = vmul.f32 %v1337_v39, %v3008_v25  ;;  %v1084_v3 = vmul.f32 %v3118_v24, %v1052_v44  ;;  %vm607_vm5 = vcmp.lt.f32.partialorder %v3127_v54, 0.0 }
 0x1f8   : > { %v3199_v23 = vpop.eup %2074  ;;  %v3207_v63 = vmul.f32 0.5, %v3133_v4  ;;  %v1306_v29 = vmul.f32 %v1274_v21, %v3050_v19  ;;  %v989_v55 = vadd.f32 -0.28449672, %v957_v5  ;;  %v894_v58 = vmul.f32 %v3181_v20, %v862_v45  ;;  %v3619_v19 = vld [vmem:[#allocation24_spill] sm:$0xff] }
 0x1f9   : > { %3618 = vst [vmem:[#allocation22_spill] sm:$0xff] %v3202_v2  ;;  %v831_v46 = vmul.f32 1.0614054, %v3199_v23  ;;  %v1275_v41 = vsub.f32 1.0, %v1243_v48  ;;  %2080 = vrcp.f32 %v737_v18  ;;  %v1121_v59 = vsub.f32 0.0, %v673_v15 }
 0x1fa   : > { %v578_v8 = vmul.f32 0.70710677, %v506_v6  ;;  %2082 = vpow2.f32 %v1204_v62  ;;  %v1206_v39 = vmul.f32 1.442695, %v1151_v22  ;;  %v1152_v24 = vmul.f32 %v1120_v60, %v672_v12 }
 0x1fb   : > { %v863_v25 = vadd.f32 -1.4531521, %v831_v46  ;;  %v1244_v44 = vmul.f32 %v2073_v9, %v1084_v3  ;;  %vm608_vm6 = vcmp.lt.f32.partialorder %v3156_v50, 0.0  ;;  %v508_v21 = vadd.f32 %v3619_v19, %v2529_v57 }
 0x1fc   : > { %v3213_v4 = vand.u32 2147483647, %v578_v8  ;;  %v1021_v45 = vmul.f32 %v3163_v40, %v989_v55  ;;  %v926_v42 = vadd.f32 1.4214138, %v894_v58  ;;  %v3221_v48 = vsel %vm607_vm5, -1.0, %v3603_v10 }
 0x1fd   : > { %v895_v62 = vmul.f32 %v3199_v23, %v863_v25  ;;  %v1338_v5 = vadd.f32 1.0, %v1306_v29  ;;  %v1307_v12 = vmul.f32 %v1275_v41, %v3081_v31  ;;  %v1153_v9 = vmul.f32 %v1121_v59, %v673_v15  ;;  %v3620_v29 = vld [vmem:[#allocation12_spill] sm:$0xff] }
 0x1fe   : > { %v706_v50 = vmul.f32 0.3275911, %v3213_v4  ;;  %v2077_v35 = vpop.eup %2076  ;;  %2084 = vpow2.f32 %v1206_v39  ;;  %v3227_v60 = vsel %vm608_vm6, -1.0, %v3603_v10  ;;  %v1208_v18 = vmul.f32 1.442695, %v1152_v24 }
 0x1ff   : > { %v927_v22 = vadd.f32 1.4214138, %v895_v62  ;;  %v3229_v3 = vpop.eup %2078  ;;  %v1276_v54 = vsub.f32 1.0, %v1244_v44  ;;  %vm609_vm7 = vcmp.lt.f32.partialorder %v3176_v51, 0.0  ;;  %v3232_v58 = vmul.f32 0.70710677, %v508_v21 }
 0x200   : > { %v738_v55 = vadd.f32 1.0, %v706_v50  ;;  %vm585_vm8 = vcmp.lt.f32.partialorder %v3620_v29, 0.0  ;;  %v1053_v31 = vadd.f32 0.2548296, %v1021_v45  ;;  %v958_v15 = vmul.f32 %v3181_v20, %v926_v42 }
 0x201   : > { %v832_v46 = vmul.f32 1.0614054, %v3229_v3  ;;  %v3238_v41 = vmul.f32 0.5, %v3161_v1  ;;  %v3241_v59 = vmul.f32 %v1338_v5, %v3032_v32  ;;  %v1339_v25 = vadd.f32 1.0, %v1307_v12 }
 0x202   : > { %v1210_v39 = vmul.f32 1.442695, %v1153_v9  ;;  %2086 = vrcp.f32 %v738_v55  ;;  %v959_v51 = vmul.f32 %v3199_v23, %v927_v22  ;;  %v3245_v44 = vsel %vm609_vm7, -1.0, %v3603_v10 }
 0x203   : > { %3621 = vst [vmem:[#allocation23_spill] sm:$0xff] %v3241_v59  ;;  %v864_v24 = vadd.f32 -1.4531521, %v832_v46  ;;  %2088 = vpow2.f32 %v1208_v18  ;;  %v3247_v19 = vpop.eup %2080  ;;  %v1308_v45 = vmul.f32 %v1276_v54, %v3123_v37  ;;  %v3250_v42 = vmul.f32 0.5, %v506_v6  ;;  %v3623_v6 = vld [vmem:[#allocation16_spill] sm:$0xff]  ;;  %v3625_v59 = vld [vmem:[#allocation18_spill] sm:$0xff] }
 0x204   : > { %vm610_vm9 = vcmp.lt.f32.partialorder %v578_v8, 0.0  ;;  %v3253_v32 = vand.u32 2147483647, %v3232_v58  ;;  %v3255_v1 = vpop.eup %2082  ;;  %v1085_v62 = vmul.f32 %v3163_v40, %v1053_v31  ;;  %v990_v5 = vadd.f32 -0.28449672, %v958_v15 }
 0x205   : > { %v896_v12 = vmul.f32 %v3229_v3, %v864_v24  ;;  %v833_v9 = vmul.f32 1.0614054, %v3247_v19  ;;  %v3261_v50 = vmul.f32 %v1339_v25, %v3074_v13  ;;  %2090 = vpow2.f32 %v1210_v39 }
 0x206   : > { %v707_v37 = vmul.f32 0.3275911, %v3253_v32  ;;  %v809_v8 = vmul.f32 1.0614054, %v3623_v6  ;;  %v991_v22 = vadd.f32 -0.28449672, %v959_v51  ;;  %v1245_v13 = vmul.f32 %v2077_v35, %v1085_v62 }
 0x207   : > { %3622 = vst [vmem:[#allocation24_spill] sm:$0xff] %v3261_v50  ;;  %v928_v18 = vadd.f32 1.4214138, %v896_v12  ;;  %v3266_v54 = vsel %vm610_vm9, -1.0, %v3603_v10  ;;  %v1122_v40 = vsub.f32 0.0, %v3213_v4  ;;  %v1340_v55 = vadd.f32 1.0, %v1308_v45 }
 0x208   : > { %v865_v31 = vadd.f32 -1.4531521, %v833_v9  ;;  %v3269_v15 = vmul.f32 0.5, %v508_v21  ;;  %v739_v46 = vadd.f32 1.0, %v707_v37  ;;  %v2085_v24 = vpop.eup %2084  ;;  %v1022_v25 = vmul.f32 %v3181_v20, %v990_v5 }
 0x209   : > { %v960_v39 = vmul.f32 %v3229_v3, %v928_v18  ;;  %v811_v50 = vmul.f32 1.0614054, %v3625_v59  ;;  %v841_v12 = vadd.f32 -1.4531521, %v809_v8  ;;  %v3277_v2 = vadd.f32 %v2883_v38, %v2527_v56 }
 0x20a   : > { %3624 = vst [vmem:[#allocation12_spill] sm:$0xff] %v3269_v15  ;;  %v897_v51 = vmul.f32 %v3247_v19, %v865_v31  ;;  %2092 = vrcp.f32 %v739_v46  ;;  %v1023_v21 = vmul.f32 %v3199_v23, %v991_v22  ;;  %v1154_v9 = vmul.f32 %v1122_v40, %v3213_v4 }
 0x20b   : > { %3626 = vst [vmem:[#allocation16_spill] sm:$0xff] %v3277_v2  ;;  %v992_v45 = vadd.f32 -0.28449672, %v960_v39  ;;  %v843_v35 = vadd.f32 -1.4531521, %v811_v50  ;;  %v3284_v5 = vmul.f32 %v1340_v55, %v3096_v53  ;;  %v3289_v8 = vsel %vm585_vm8, -1.0, %v3603_v10 }
 0x20c   : > { %v3281_v62 = vpop.eup %2086  ;;  %v929_v37 = vadd.f32 1.4214138, %v897_v51  ;;  %v873_v38 = vmul.f32 %v3623_v6, %v841_v12  ;;  %v1277_v31 = vsub.f32 1.0, %v1245_v13  ;;  %v1054_v22 = vadd.f32 0.2548296, %v1022_v25 }
 0x20d   : > { %3627 = vst [vmem:[#allocation18_spill] sm:$0xff] %v3284_v5  ;;  %v2089_v18 = vpop.eup %2088  ;;  %v1024_v46 = vmul.f32 %v3229_v3, %v992_v45  ;;  %v834_v4 = vmul.f32 1.0614054, %v3281_v62  ;;  %v875_v53 = vmul.f32 %v3625_v59, %v843_v35  ;;  %v3297_v55 = vmul.f32 0.70710677, %v3277_v2 }
 0x20e   : > { %v961_v50 = vmul.f32 %v3247_v19, %v929_v37  ;;  %v905_v40 = vadd.f32 1.4214138, %v873_v38  ;;  %v1055_v29 = vadd.f32 0.2548296, %v1023_v21  ;;  %v1123_v51 = vsub.f32 0.0, %v3253_v32  ;;  %v3629_v21 = vld [vmem:[#allocation13_spill] sm:$0xff] }
 0x20f   : > { %3628 = vst [vmem:[#allocation29_spill] sm:$0xff] %v3297_v55  ;;  %v866_v39 = vadd.f32 -1.4531521, %v834_v4  ;;  %v2091_v25 = vpop.eup %2090  ;;  %v1212_v45 = vmul.f32 1.442695, %v1154_v9  ;;  %v1086_v37 = vmul.f32 %v3181_v20, %v1054_v22  ;;  %vm611_vm10 = vcmp.lt.f32.partialorder %v3232_v58, 0.0 }
 0x210   : > { %v993_v12 = vadd.f32 -0.28449672, %v961_v50  ;;  %v907_v5 = vadd.f32 1.4214138, %v875_v53  ;;  %v937_v15 = vmul.f32 %v3623_v6, %v905_v40  ;;  %v1056_v35 = vadd.f32 0.2548296, %v1024_v46 }
 0x211   : > { %v898_v38 = vmul.f32 %v3281_v62, %v866_v39  ;;  %vm587_vm11 = vcmp.lt.f32.partialorder %v3629_v21, 0.0  ;;  %v3310_v50 = vand.u32 2147483647, %v3297_v55  ;;  %v1309_v9 = vmul.f32 %v1277_v31, %v3149_v30 }
 0x212   : > { %v1025_v4 = vmul.f32 %v3247_v19, %v993_v12  ;;  %v939_v2 = vmul.f32 %v3625_v59, %v907_v5  ;;  %v969_v13 = vadd.f32 -0.28449672, %v937_v15  ;;  %v1087_v53 = vmul.f32 %v3199_v23, %v1055_v29 }
 0x213   : > { %v930_v20 = vadd.f32 1.4214138, %v898_v38  ;;  %v1155_v22 = vmul.f32 %v1123_v51, %v3253_v32  ;;  %2094 = vpow2.f32 %v1212_v45  ;;  %v708_v12 = vmul.f32 0.3275911, %v3310_v50 }
 0x214   : > { %v3315_v46 = vpop.eup %2092  ;;  %v971_v40 = vadd.f32 -0.28449672, %v939_v2  ;;  %v1001_v39 = vmul.f32 %v3623_v6, %v969_v13  ;;  %v1246_v15 = vmul.f32 %v3255_v1, %v1086_v37  ;;  %v1057_v5 = vadd.f32 0.2548296, %v1025_v4 }
 0x215   : > { %v962_v55 = vmul.f32 %v3281_v62, %v930_v20  ;;  %v835_v30 = vmul.f32 1.0614054, %v3315_v46  ;;  %v1088_v23 = vmul.f32 %v3229_v3, %v1056_v35  ;;  %v740_v29 = vadd.f32 1.0, %v708_v12 }
 0x216   : > { %v1003_v31 = vmul.f32 %v3625_v59, %v971_v40  ;;  %v1033_v32 = vadd.f32 0.2548296, %v1001_v39  ;;  %v1247_v51 = vmul.f32 %v2085_v24, %v1087_v53  ;;  %v1214_v38 = vmul.f32 1.442695, %v1155_v22  ;;  %v3630_v53 = vld [vmem:[#allocation17_spill] sm:$0xff]  ;;  %v3631_v39 = vld [vmem:[#allocation19_spill] sm:$0xff] }
 0x217   : > { %v994_v45 = vadd.f32 -0.28449672, %v962_v55  ;;  %v867_v2 = vadd.f32 -1.4531521, %v835_v30  ;;  %2096 = vrcp.f32 %v740_v29  ;;  %v3327_v1 = vadd.f32 %v2903_v17, %v2529_v57 }
 0x218   : > { %v1035_v13 = vadd.f32 0.2548296, %v1003_v31  ;;  %v1065_v14 = vmul.f32 %v3623_v6, %v1033_v32  ;;  %v1089_v37 = vmul.f32 %v3247_v19, %v1057_v5  ;;  %v3334_v35 = vsel %vm611_vm10, -1.0, %v3603_v10 }
 0x219   : > { %v1026_v3 = vmul.f32 %v3281_v62, %v994_v45  ;;  %v899_v24 = vmul.f32 %v3315_v46, %v867_v2  ;;  %v1341_v55 = vadd.f32 1.0, %v1309_v9  ;;  %v1248_v4 = vmul.f32 %v2089_v18, %v1088_v23 }
 0x21a   : > { %v1067_v6 = vmul.f32 %v3625_v59, %v1035_v13  ;;  %v1225_v20 = vmul.f32 %v3630_v53, %v1065_v14  ;;  %v1278_v22 = vsub.f32 1.0, %v1246_v15  ;;  %2098 = vpow2.f32 %v1214_v38 }
 0x21b   : > { %v1058_v17 = vadd.f32 0.2548296, %v1026_v3  ;;  %v931_v40 = vadd.f32 1.4214138, %v899_v24  ;;  %v1279_v19 = vsub.f32 1.0, %v1247_v51  ;;  %v1249_v30 = vmul.f32 %v2091_v25, %v1089_v37 }
 0x21c   : > { %v1227_v12 = vmul.f32 %v3631_v39, %v1067_v6  ;;  %v1257_v5 = vsub.f32 1.0, %v1225_v20  ;;  %v3341_v58 = vmul.f32 0.70710677, %v3327_v1  ;;  %v619_v14 = vsel %vm587_vm11, -1.0, %v3603_v10  ;;  %v3632_v20 = vld [vmem:[#allocation14_spill] sm:$0xff] }
 0x21d   : > { %v1090_v31 = vmul.f32 %v3281_v62, %v1058_v17  ;;  %v963_v18 = vmul.f32 %v3315_v46, %v931_v40  ;;  %v2095_v59 = vpop.eup %2094  ;;  %v1280_v9 = vsub.f32 1.0, %v1248_v4  ;;  %v3351_v32 = vadd.f32 %v2907_v61, %v2527_v56  ;;  %v3633_v17 = vld [vmem:[#allocation15_spill] sm:$0xff] }
 0x21e   : > { %v1259_v15 = vsub.f32 1.0, %v1227_v12  ;;  %v1289_v23 = vmul.f32 %v1257_v5, %v3289_v8  ;;  %v3354_v29 = vmul.f32 %v1341_v55, %v3144_v16  ;;  %v3357_v51 = vand.u32 2147483647, %v3341_v58 }
 0x21f   : > { %v1250_v25 = vmul.f32 %v2095_v59, %v1090_v31  ;;  %v995_v62 = vadd.f32 -0.28449672, %v963_v18  ;;  %v1310_v21 = vmul.f32 %v1278_v22, %v3186_v33  ;;  %v1311_v45 = vmul.f32 %v1279_v19, %v3221_v48 }
 0x220   : > { %v1291_v2 = vmul.f32 %v1259_v15, %v619_v14  ;;  %v1321_v38 = vadd.f32 1.0, %v1289_v23  ;;  %v1281_v13 = vsub.f32 1.0, %v1249_v30  ;;  %v709_v56 = vmul.f32 0.3275911, %v3357_v51 }
 0x221   : > { %v1282_v8 = vsub.f32 1.0, %v1250_v25  ;;  %v1027_v37 = vmul.f32 %v3315_v46, %v995_v62  ;;  %v3363_v61 = vpop.eup %2096  ;;  %v1312_v16 = vmul.f32 %v1280_v9, %v3227_v60  ;;  %v1124_v24 = vsub.f32 0.0, %v3310_v50 }
 0x222   : > { %v1323_v3 = vadd.f32 1.0, %v1291_v2  ;;  %v3368_v55 = vmul.f32 0.70710677, %v3351_v32  ;;  %v836_v48 = vmul.f32 1.0614054, %v3363_v61  ;;  %v741_v4 = vadd.f32 1.0, %v709_v56 }
 0x223   : > { %v1059_v33 = vadd.f32 0.2548296, %v1027_v37  ;;  %v3373_v6 = vadd.f32 %v2912_v49, %v2529_v57  ;;  %v1314_v53 = vmul.f32 %v1282_v8, %v3266_v54  ;;  %v1353_v22 = vmul.f32 %v1321_v38, %v3632_v20  ;;  %v3636_v2 = vld [vmem:[#allocation26_spill] sm:$0xff]  ;;  %v3637_v8 = vld [vmem:[#allocation28_spill] sm:$0xff] }
 0x224   : > { %v1355_v60 = vmul.f32 %v1323_v3, %v3633_v17  ;;  %v3379_v40 = vand.u32 2147483647, %v3368_v55  ;;  %v2099_v19 = vpop.eup %2098  ;;  %v1313_v39 = vmul.f32 %v1281_v13, %v3245_v44  ;;  %v868_v5 = vadd.f32 -1.4531521, %v836_v48  ;;  %v3641_v20 = vld [vmem:[#allocation24_spill] sm:$0xff]  ;;  %v3643_v17 = vld [vmem:[#allocation23_spill] sm:$0xff] }
 0x225   : > { %v1091_v12 = vmul.f32 %v3315_v46, %v1059_v33  ;;  %2100 = vrcp.f32 %v741_v4  ;;  %v1342_v30 = vadd.f32 1.0, %v1310_v21  ;;  %v1343_v31 = vadd.f32 1.0, %v1311_v45  ;;  %v3635_v45 = vld [vmem:[#allocation25_spill] sm:$0xff]  ;;  %v3639_v33 = vld [vmem:[#allocation20_spill] sm:$0xff] }
 0x226   : > { %v1385_v57 = vpack.c.bf16 %v1355_v60, %v1353_v22  ;;  %v710_v49 = vmul.f32 0.3275911, %v3379_v40  ;;  %v1344_v54 = vadd.f32 1.0, %v1312_v16  ;;  %v900_v14 = vmul.f32 %v3363_v61, %v868_v5  ;;  %v3638_v16 = vld [vmem:[#allocation27_spill] sm:$0xff] }
 0x227   : > { %v1251_v18 = vmul.f32 %v2099_v19, %v1091_v12  ;;  %v1156_v59 = vmul.f32 %v1124_v24, %v3310_v50  ;;  %v1346_v9 = vadd.f32 1.0, %v1314_v53  ;;  %v3387_v44 = vmul.f32 0.70710677, %v3373_v6  ;;  %v3640_v53 = vld [vmem:[#allocation22_spill] sm:$0xff] }
 0x228   : > { %1567 = vmatprep.mubr.bf16.mxu1 %v1385_v57  ;;  %v742_v15 = vadd.f32 1.0, %v710_v49  ;;  %v1387_v46 = vpack.c.bf16 %v2887_v28, %v2845_v34  ;;  %v1345_v23 = vadd.f32 1.0, %v1313_v39  ;;  %v932_v62 = vadd.f32 1.4214138, %v900_v14  ;;  %v3645_v39 = vld [vmem:[#allocation18_spill] sm:$0xff] }
 0x229   : > { %v1283_v25 = vsub.f32 1.0, %v1251_v18  ;;  %v3634_v21 = vpack.c.bf16 %v2823_v52, %v2807_v26  ;;  %v1386_v38 = vpack.c.bf16 %v3636_v2, %v3635_v45  ;;  %v3397_v50 = vmul.f32 %v1342_v30, %v3168_v36 }
 0x22a   : > { %2102 = vrcp.f32 %v742_v15  ;;  %v679_v13 = vand.u32 2147483647, %v3387_v44  ;;  %v1389_v34 = vpack.c.bf16 %v3054_v27, %v3637_v8  ;;  %v3403_v28 = vmul.f32 %v1343_v31, %v3196_v7 }
 0x22b   : > { %1568 = vmatmul.mubr.bf16.vlgmr.msra.gmra.mrb[0].mxu1 %v3634_v21  ;;  %v1315_v37 = vmul.f32 %v1283_v25, %v3334_v35  ;;  %v964_v26 = vmul.f32 %v3363_v61, %v932_v62  ;;  %v1216_v52 = vmul.f32 1.442695, %v1156_v59  ;;  %v3408_v56 = vmul.f32 %v1346_v9, %v3250_v42 }
 0x22c   : > { %1575 = vmatprep.mubr.bf16.mxu1 %v1387_v46  ;;  %v711_v36 = vmul.f32 0.3275911, %v679_v13  ;;  %v1388_v3 = vpack.c.bf16 %v3016_v47, %v3638_v16  ;;  %v1391_v24 = vpack.c.bf16 %v3141_v0, %v3103_v43  ;;  %v3415_v27 = vmul.f32 %v1344_v54, %v3207_v63  ;;  %v3642_v47 = vld [vmem:[#allocation21_spill] sm:$0xff]  ;;  %v3644_v0 = vld [vmem:[#allocation12_spill] sm:$0xff] }
 0x22d   : > { %v3418_v7 = vmul.f32 %v1345_v23, %v3238_v41  ;;  %v1347_v35 = vadd.f32 1.0, %v1315_v37  ;;  %v1390_v48 = vpack.c.bf16 %v3639_v33, %v3071_v11  ;;  %v1125_v42 = vsub.f32 0.0, %v3357_v51 }
 0x22e   : > { %v743_v4 = vadd.f32 1.0, %v711_v36  ;;  %v1393_v22 = vpack.c.bf16 %v3641_v20, %v3640_v53  ;;  %v1392_v60 = vpack.c.bf16 %v3643_v17, %v3642_v47  ;;  %v996_v19 = vadd.f32 -0.28449672, %v964_v26 }
 0x22f   : > { %v2101_v43 = vpop.eup %2100  ;;  %v3428_v63 = vmul.f32 %v1347_v35, %v3644_v0  ;;  %v1395_v41 = vpack.c.bf16 %v3403_v28, %v3354_v29  ;;  %v1394_v11 = vpack.c.bf16 %v3397_v50, %v3645_v39  ;;  %v1126_v5 = vsub.f32 0.0, %v3379_v40 }
 0x230   : > { %v837_v12 = vmul.f32 1.0614054, %v2101_v43  ;;  %2104 = vrcp.f32 %v743_v4  ;;  %v1396_v30 = vpack.c.bf16 %v3408_v56, %v3415_v27  ;;  %v1157_v49 = vmul.f32 %v1125_v42, %v3357_v51 }
 0x231   : > { %v1397_v31 = vpack.c.bf16 %v3428_v63, %v3418_v7  ;;  %v1028_v54 = vmul.f32 %v3363_v61, %v996_v19  ;;  %2106 = vpow2.f32 %v1216_v52  ;;  %v1158_v59 = vmul.f32 %v1126_v5, %v3379_v40  ;;  %v3473_v7 = vld [vmem:[%s3565_s4] ss:$0 sm:$0xff] }
 0x232   : > { %v869_v57 = vadd.f32 -1.4531521, %v837_v12  ;;  %v1218_v46 = vmul.f32 1.442695, %v1157_v49  ;;  %v1127_v23 = vsub.f32 0.0, %v679_v13  ;;  %vm614_vm13 = vcmp.lt.f32.partialorder %v3368_v55, 0.0 }
 0x233   : > { %1576 = vmatmul.mubr.bf16.gmra.mrb[4].mxu1 %v1386_v38  ;;  %v1060_v25 = vadd.f32 0.2548296, %v1028_v54  ;;  %v1220_v45 = vmul.f32 1.442695, %v1158_v59  ;;  %vm613_vm14 = vcmp.lt.f32.partialorder %v3341_v58, 0.0  ;;  %vm615_vm15 = vcmp.lt.f32.partialorder %v3387_v44, 0.0 }
 0x234   : > { %1583 = vmatprep.mubr.bf16.mxu1 %v1389_v34  ;;  %v2103_v18 = vpop.eup %2102  ;;  %v901_v14 = vmul.f32 %v2101_v43, %v869_v57  ;;  %2108 = vpow2.f32 %v1218_v46  ;;  %v1159_v8 = vmul.f32 %v1127_v23, %v679_v13  ;;  %v3646_v13 = vld [vmem:[#allocation29_spill] sm:$0xff]  ;;  %v645_v58 = vsel %vm613_vm14, -1.0, %v3603_v10 }
 0x235   : > { %v838_v9 = vmul.f32 1.0614054, %v2103_v18  ;;  %v1092_v34 = vmul.f32 %v3363_v61, %v1060_v25  ;;  %2110 = vpow2.f32 %v1220_v45  ;;  %vm612_vm12 = vcmp.lt.f32.partialorder %v3646_v13, 0.0 }
 0x236   : > { %v933_v15 = vadd.f32 1.4214138, %v901_v14  ;;  %v1222_v33 = vmul.f32 1.442695, %v1159_v8  ;;  %v644_v14 = vsel %vm612_vm12, -1.0, %v3603_v10  ;;  %v550_v45 = vmul.f32 0.5, %v3351_v32 }
 0x237   : > { %v870_v62 = vadd.f32 -1.4531521, %v838_v9  ;;  %v647_v29 = vsel %vm615_vm15, -1.0, %v3603_v10  ;;  %v549_v32 = vmul.f32 0.5, %v3327_v1  ;;  %v551_v44 = vmul.f32 0.5, %v3373_v6 }
 0x238   : > { %v965_v21 = vmul.f32 %v2101_v43, %v933_v15  ;;  %2112 = vpow2.f32 %v1222_v33 }
 0x239   : > { %v902_v2 = vmul.f32 %v2103_v18, %v870_v62  ;;  %v3647_v62 = vld [vmem:[#allocation16_spill] sm:$0xff] }
 0x23a   : > { %v2105_v38 = vpop.eup %2104  ;;  %v997_v51 = vadd.f32 -0.28449672, %v965_v21  ;;  %v548_v21 = vmul.f32 0.5, %v3647_v62 }
 0x23b   : > { %1584 = vmatmul.mubr.bf16.gmra.mrb[8].mxu1 %v1388_v3  ;;  %v934_v37 = vadd.f32 1.4214138, %v902_v2  ;;  %v839_v26 = vmul.f32 1.0614054, %v2105_v38  ;;  %v2107_v16 = vpop.eup %2106 }
 0x23c   : > { %1591 = vmatprep.mubr.bf16.mxu1 %v1391_v24  ;;  %v1029_v40 = vmul.f32 %v2101_v43, %v997_v51  ;;  %v1252_v42 = vmul.f32 %v2107_v16, %v1092_v34 }
 0x23d   : > { %v966_v52 = vmul.f32 %v2103_v18, %v934_v37  ;;  %v871_v36 = vadd.f32 -1.4531521, %v839_v26 }
 0x23e   : > { %v1061_v35 = vadd.f32 0.2548296, %v1029_v40  ;;  %v1284_v61 = vsub.f32 1.0, %v1252_v42  ;;  %v2109_v12 = vpop.eup %2108 }
 0x23f   : > { %v998_v4 = vadd.f32 -0.28449672, %v966_v52  ;;  %v903_v53 = vmul.f32 %v2105_v38, %v871_v36  ;;  %v2111_v54 = vpop.eup %2110 }
 0x240   : > { %v1093_v3 = vmul.f32 %v2101_v43, %v1061_v35  ;;  %v1316_v59 = vmul.f32 %v1284_v61, %v644_v14 }
 0x241   : > { %v1030_v20 = vmul.f32 %v2103_v18, %v998_v4  ;;  %v935_v0 = vadd.f32 1.4214138, %v903_v53 }
 0x242   : > { %v1253_v5 = vmul.f32 %v2109_v12, %v1093_v3  ;;  %v1348_v46 = vadd.f32 1.0, %v1316_v59  ;;  %v2113_v25 = vpop.eup %2112 }
 0x243   : > { %1592 = vmatmul.mubr.bf16.gmra.mrb[12].mxu1 %v1390_v48  ;;  %v1062_v24 = vadd.f32 0.2548296, %v1030_v20  ;;  %v967_v19 = vmul.f32 %v2105_v38, %v935_v0 }
 0x244   : > { %1599 = vmatprep.mubr.bf16.mxu1 %v1393_v22  ;;  %v1285_v48 = vsub.f32 1.0, %v1253_v5  ;;  %v1380_v17 = vmul.f32 %v1348_v46, %v548_v21 }
 0x245   : > { %v1094_v57 = vmul.f32 %v2103_v18, %v1062_v24  ;;  %v999_v49 = vadd.f32 -0.28449672, %v967_v19  ;;  %v646_v18 = vsel %vm614_vm13, -1.0, %v3603_v10 }
 0x246   : > { %v1317_v2 = vmul.f32 %v1285_v48, %v645_v58 }
 0x247   : > { %v1254_v43 = vmul.f32 %v2111_v54, %v1094_v57  ;;  %v1031_v9 = vmul.f32 %v2105_v38, %v999_v49 }
 0x248   : > { %v1349_v28 = vadd.f32 1.0, %v1317_v2 }
 0x249   : > { %v1286_v22 = vsub.f32 1.0, %v1254_v43  ;;  %v1063_v15 = vadd.f32 0.2548296, %v1031_v9 }
 0x24a   : > { %v1381_v37 = vmul.f32 %v1349_v28, %v549_v32 }
 0x24b   : > { %1600 = vmatmul.mubr.bf16.gmra.mrb[16].mxu1 %v1392_v60  ;;  %v1318_v23 = vmul.f32 %v1286_v22, %v646_v18  ;;  %v1095_v55 = vmul.f32 %v2105_v38, %v1063_v15 }
 0x24c   : > { %1607 = vmatprep.mubr.bf16.mxu1 %v1395_v41 }
 0x24d   : > { %v1350_v51 = vadd.f32 1.0, %v1318_v23  ;;  %v1255_v47 = vmul.f32 %v2113_v25, %v1095_v55 }
 0x24f   : > { %v1382_v60 = vmul.f32 %v1350_v51, %v550_v45  ;;  %v1287_v8 = vsub.f32 1.0, %v1255_v47 }
 0x251   : > { %v1319_v41 = vmul.f32 %v1287_v8, %v647_v29  ;;  %v1398_v38 = vpack.c.bf16 %v1382_v60, %v1380_v17 }
 0x253   : > { %1608 = vmatmul.mubr.bf16.gmra.mrb[20].mxu1 %v1394_v11  ;;  %v1351_v34 = vadd.f32 1.0, %v1319_v41 }
 0x254   : > { %1615 = vmatprep.mubr.bf16.mxu1 %v1397_v31 }
 0x255   : > { %v1383_v26 = vmul.f32 %v1351_v34, %v551_v44 }
 0x257   : > { %v1399_v10 = vpack.c.bf16 %v1383_v26, %v1381_v37 }
 0x25b   : > { %1616 = vmatmul.mubr.bf16.gmra.mrb[24].mxu1 %v1396_v30 }
 0x25c   : > { %1623 = vmatprep.mubr.bf16.mxu1 %v1399_v10 }
 0x263   : > { %1624 = vmatmul.mubr.bf16.gmra.mrb[28].mxu1 %v1398_v38 }
 0x2fe   : > { %v1823_v50 = vpop.f32.mrb[0].mxu1 }
 0x2ff   : > { %v1824_v1 = vpop.f32.mrb[1].mxu1 }
 0x300   : > { %v1825_v63 = vadd.f32 %v1824_v1, %v1823_v50  ;;  %v1826_v6 = vpop.f32.mrb[2].mxu1 }
 0x301   : > { %v1827_v39 = vpop.f32.mrb[3].mxu1 }
 0x302   : > { %v1570_v11 = vadd.f32 %v1825_v63, %v3473_v7  ;;  %v1828_v31 = vadd.f32 %v1827_v39, %v1826_v6 }
 0x304   : > { %1632 = vst [vmem:[%s3478_s28] sm:$0xff] %v1570_v11  ;;  %v1573_v56 = vadd.f32 %v1828_v31, %v3473_v7 }
 0x306   : > { %1633 = vst [vmem:[%s3478_s28 + $0x8] sm:$0xff] %v1573_v56  ;;  %v1829_v27 = vpop.f32.mrb[4].mxu1 }
 0x307   : > { %v1830_v30 = vpop.f32.mrb[5].mxu1 }
 0x308   : > { %v1831_v40 = vadd.f32 %v1830_v30, %v1829_v27  ;;  %v1832_v52 = vpop.f32.mrb[6].mxu1 }
 0x309   : > { %v1833_v36 = vpop.f32.mrb[7].mxu1 }
 0x30a   : > { %v1578_v16 = vadd.f32 %v1831_v40, %v3473_v7  ;;  %v1834_v35 = vadd.f32 %v1833_v36, %v1832_v52 }
 0x30c   : > { %1634 = vst [vmem:[%s3478_s28 + $0x10] sm:$0xff] %v1578_v16  ;;  %v1581_v33 = vadd.f32 %v1834_v35, %v3473_v7 }
 0x30e   : > { %1635 = vst [vmem:[%s3478_s28 + $0x18] sm:$0xff] %v1581_v33  ;;  %v1835_v42 = vpop.f32.mrb[8].mxu1 }
 0x30f   : > { %v1836_v4 = vpop.f32.mrb[9].mxu1 }
 0x310   : > { %v1837_v53 = vadd.f32 %v1836_v4, %v1835_v42  ;;  %v1838_v3 = vpop.f32.mrb[10].mxu1 }
 0x311   : > { %v1839_v20 = vpop.f32.mrb[11].mxu1 }
 0x312   : > { %v1586_v0 = vadd.f32 %v1837_v53, %v3473_v7  ;;  %v1840_v13 = vadd.f32 %v1839_v20, %v1838_v3 }
 0x314   : > { %1636 = vst [vmem:[%s3478_s28 + $0x20] sm:$0xff] %v1586_v0  ;;  %v1589_v61 = vadd.f32 %v1840_v13, %v3473_v7 }
 0x316   : > { %1637 = vst [vmem:[%s3478_s28 + $0x28] sm:$0xff] %v1589_v61  ;;  %v1841_v24 = vpop.f32.mrb[12].mxu1 }
 0x317   : > { %v1842_v19 = vpop.f32.mrb[13].mxu1 }
 0x318   : > { %v1843_v12 = vadd.f32 %v1842_v19, %v1841_v24  ;;  %v1844_v5 = vpop.f32.mrb[14].mxu1 }
 0x319   : > { %v1845_v57 = vpop.f32.mrb[15].mxu1 }
 0x31a   : > { %v1594_v49 = vadd.f32 %v1843_v12, %v3473_v7  ;;  %v1846_v54 = vadd.f32 %v1845_v57, %v1844_v5 }
 0x31c   : > { %1638 = vst [vmem:[%s3478_s28 + $0x30] sm:$0xff] %v1594_v49  ;;  %v1597_v14 = vadd.f32 %v1846_v54, %v3473_v7 }
 0x31e   : > { %1639 = vst [vmem:[%s3478_s28 + $0x38] sm:$0xff] %v1597_v14  ;;  %v1847_v59 = vpop.f32.mrb[16].mxu1 }
 0x31f   : > { %v1848_v43 = vpop.f32.mrb[17].mxu1 }
 0x320   : > { %v1849_v9 = vadd.f32 %v1848_v43, %v1847_v59  ;;  %v1850_v48 = vpop.f32.mrb[18].mxu1 }
 0x321   : > { %v1851_v22 = vpop.f32.mrb[19].mxu1 }
 0x322   : > { %v1602_v15 = vadd.f32 %v1849_v9, %v3473_v7  ;;  %v1852_v18 = vadd.f32 %v1851_v22, %v1850_v48 }
 0x324   : > { %1640 = vst [vmem:[%s3478_s28 + $0x40] sm:$0xff] %v1602_v15  ;;  %v1605_v46 = vadd.f32 %v1852_v18, %v3473_v7 }
 0x326   : > { %1641 = vst [vmem:[%s3478_s28 + $0x48] sm:$0xff] %v1605_v46  ;;  %v1853_v23 = vpop.f32.mrb[20].mxu1 }
 0x327   : > { %v1854_v55 = vpop.f32.mrb[21].mxu1 }
 0x328   : > { %v1855_v25 = vadd.f32 %v1854_v55, %v1853_v23  ;;  %v1856_v62 = vpop.f32.mrb[22].mxu1 }
 0x329   : > { %v1857_v21 = vpop.f32.mrb[23].mxu1 }
 0x32a   : > { %v1610_v58 = vadd.f32 %v1855_v25, %v3473_v7  ;;  %v1858_v45 = vadd.f32 %v1857_v21, %v1856_v62 }
 0x32c   : > { %1642 = vst [vmem:[%s3478_s28 + $0x50] sm:$0xff] %v1610_v58  ;;  %v1613_v2 = vadd.f32 %v1858_v45, %v3473_v7 }
 0x32e   : > { %1643 = vst [vmem:[%s3478_s28 + $0x58] sm:$0xff] %v1613_v2  ;;  %v1859_v51 = vpop.f32.mrb[24].mxu1 }
 0x32f   : > { %v1860_v47 = vpop.f32.mrb[25].mxu1 }
 0x330   : > { %v1861_v17 = vadd.f32 %v1860_v47, %v1859_v51  ;;  %v1862_v60 = vpop.f32.mrb[26].mxu1 }
 0x331   : > { %v1863_v8 = vpop.f32.mrb[27].mxu1 }
 0x332   : > { %v1618_v29 = vadd.f32 %v1861_v17, %v3473_v7  ;;  %v1864_v28 = vadd.f32 %v1863_v8, %v1862_v60 }
 0x334   : > { %1644 = vst [vmem:[%s3478_s28 + $0x60] sm:$0xff] %v1618_v29  ;;  %v1621_v41 = vadd.f32 %v1864_v28, %v3473_v7 }
 0x336   : > { %1645 = vst [vmem:[%s3478_s28 + $0x68] sm:$0xff] %v1621_v41  ;;  %v1865_v38 = vpop.f32.mrb[28].mxu1 }
 0x337   : > { %v1866_v32 = vpop.f32.mrb[29].mxu1 }
 0x338   : > { %v1867_v44 = vadd.f32 %v1866_v32, %v1865_v38  ;;  %v1868_v34 = vpop.f32.mrb[30].mxu1 }
 0x339   : > { %v1869_v37 = vpop.f32.mrb[31].mxu1 }
 0x33a   : > { %v1626_v26 = vadd.f32 %v1867_v44, %v3473_v7  ;;  %v1870_v10 = vadd.f32 %v1869_v37, %v1868_v34 }
 0x33c   : > { %1646 = vst [vmem:[%s3478_s28 + $0x70] sm:$0xff] %v1626_v26  ;;  %v1629_v50 = vadd.f32 %v1870_v10, %v3473_v7 }
 0x33e   : > { %1647 = vst [vmem:[%s3478_s28 + $0x78] sm:$0xff] %v1629_v50 }
 0x33f   : > { %2213 = shalt.err (!%p2210_p7)
}
 0x340   : > { %s2214_s14 = scalar_lea.hbm %s3513_s12, 2048  ;;  %s2218_s15 = scalar_lea.hbm %s3566_s5, 8192 }
 0x341   : > { %p2215_p9 = scmp.ne.s32.totalorder %s3513_s12, %s2214_s14  ;;  %p2219_p5 = scmp.lt.u32.totalorder %s3513_s12, %s3566_s5 }
 0x342   : > { %p2220_p10 = scmp.lt.u32.totalorder %s2218_s15, %s2214_s14  ;;  %p2222_p2 = scmp.lt.u32.totalorder %s2214_s14, %s3513_s12 }
 0x343   : > { %p2216_p12 = pnand %p2215_p9, %p2432_p8 }
 0x344   : > { %p2221_p1 = por %p2220_p10, %p2219_p5 }
 0x345   : > { %p2217_p0 = pneg %p2216_p12 }
 0x346   : > { %p2223_p4 = por %p2222_p2, %p2221_p1 }
 0x348   : > { %p2224_p6 = pnand %p2223_p4, %p2217_p0 }
 0x34a   : > { %2227 = shalt.err (!%p2224_p6)
}
 0x34b   : > { %s2282_s13 = smov 128   ;;  %s2283_s11 = smov 8  }
 0x34c   : > { %1881 = dma.vmem_to_hbm [thread:$0]  (%p2432_p8), %s3515_s17, 2048, %s3513_s12, %s1649_s22, %s2282_s13, %s2282_s13, %s2283_s11  }
 0x34d PF: > { %p1903_p11 = scmp.ge.s32.totalorder %s2270_s21, 2  ;;  %s1677_s29 = sand.u32 1, %s2258_s18  }
 0x34e   : > { %p3648_p13 = scmp.ne.s32.totalorder %s3584_s25, 0  ;;  %s1678_s30 = scalar_lea.sflag [#allocation4], %s1677_s29 }
 0x350   : > { %p1895_p3 = pnand %p1903_p11, %p3648_p13 }
 0x352   : > { %2253 = dma.done.wait (!%p1895_p3), %s1678_s30, 2048  }
 0x353   : > { %2255 = vsyncadd (!%p1895_p3), %s1678_s30, 4294965248  ;;  %p19_p7 = scmp.ge.s32.totalorder %s2419_s23, 6   ;;  %s3649_s18 = smov %s2262_s19 }
 0x354   : > { %s3650_s19 = smov %s2266_s20  ;;  %s3651_s20 = smov %s2428_s7 }
 0x355   : > { %s3652_s21 = smov %s2419_s23  ;;  %21 = sbr.rel (!%p19_p7) target bundleno = 6 (0x6), region = 93 }
 0x35c   :  { %1683 = vsyncpa [#allocation3], 1 }
 0x35d   :  { %1685 = vsyncpa [#allocation3 + $0x1], 1 }
 0x35e   :  { %1686 = vsyncpa [#allocation6], 1 }
 0x35f   :  { %1687 = vsyncpa [#allocation4], 1 }
 0x360   :  { %1689 = vsyncpa [#allocation4 + $0x1], 1 }

</bundles_post_ra>
